<compile_context>
chip_gen: v7x
topology: tpu7x:2x2x1
jax: 0.10.0
libtpu: 0.0.40
codegen_flags: <defaults>
</compile_context>

<pallas_src>
import functools

import jax
import jax.numpy as jnp
from jax import lax
from jax.experimental import pallas as pl
from jax.experimental.pallas import tpu as pltpu


def _round_up(x, m):
    return ((x + m - 1) // m) * m


def _kl_discret_loss_kernel(ox_ref, tx_ref, oy_ref, ty_ref, w_ref, out_ref, *,
                            total_rows):
    """One row-tile. Rows = (sample, joint) pairs, lanes = SimCC bins."""
    tm = ox_ref.shape[0]
    row0 = pl.program_id(0) * tm
    # Valid-row mask for the (possibly partial) last block: OOB rows hold unspecified
    # data, so both the KL term and the weight must be masked before any reduction.
    row_ids = row0 + lax.broadcasted_iota(jnp.int32, (tm, 1), 0)
    valid = row_ids < total_rows                                        # (tm, 1)

    # NOTE: (tm, 1) weight block is a lane-width-1 block (masked narrow loads, 128x VMEM
    # padding for this buffer) -- small relative to the wide inputs; keep it that way.
    w = jnp.where(valid, w_ref[...].astype(jnp.float32), 0.0)           # (tm, 1)

    def head(o_ref, t_ref):
        o = o_ref[...].astype(jnp.float32)                              # (tm, W)
        t = t_ref[...].astype(jnp.float32)                              # (tm, W)
        # Numerically stable log_softmax over the lane (bin) axis.
        m = jnp.max(o, axis=-1, keepdims=True)
        z = o - m
        lse = jnp.log(jnp.sum(jnp.exp(z), axis=-1, keepdims=True))
        s = z - lse                                                     # log_softmax(o)
        # KLDivLoss(reduction='none'): where(t > 0, t * (log t - s), 0); also zero out
        # invalid (OOB) rows so garbage logits/targets cannot contribute.
        safe_t = jnp.where(t > 0, t, 1.0)
        kl = jnp.where(valid & (t > 0), t * (jnp.log(safe_t) - s), 0.0)
        row_sum = jnp.sum(kl, axis=-1, keepdims=True)                   # (tm, 1)
        tile_sum = jnp.sum(row_sum * w, axis=0, keepdims=True)          # (1, 1)
        return tile_sum * (1.0 / o.shape[-1])                           # fold 1/W here

    tile_sum = head(ox_ref, tx_ref) + head(oy_ref, ty_ref)              # (1, 1)

    # Lane-dense (8,128) output block; spread tile_sum/1024 so the wrapper's jnp.sum of
    # the whole block recovers exactly tile_sum (1/1024 is a power of two -> exact).
    out_ref[...] = jnp.broadcast_to(tile_sum * (1.0 / (8 * 128)), (8, 128))


def kl_discret_loss_pallas(output_x, output_y, target_x, target_y,
                           target_weight, *, tm=None):
    """output_x/target_x: (N,K,Wx); output_y/target_y: (N,K,Wy); target_weight: (N,K)."""
    N, K, Wx = output_x.shape
    Wy = output_y.shape[-1]
    M = N * K

    # Keep native dtypes (bf16 stays bf16 -> half the HBM traffic); reshapes are free.
    ox = output_x.reshape(M, Wx)
    tx = target_x.reshape(M, Wx)
    oy = output_y.reshape(M, Wy)
    ty = target_y.reshape(M, Wy)
    w = target_weight.reshape(M, 1)

    wide_bytes_per_row = (ox.dtype.itemsize + tx.dtype.itemsize) * Wx \
                       + (oy.dtype.itemsize + ty.dtype.itemsize) * Wy
    bytes_per_row = wide_bytes_per_row + w.dtype.itemsize

    if tm is None:
        # Largest tile whose double-buffered input set stays around ~16 MiB (fits v7x's
        # 64 MiB physical VMEM with headroom), multiple of 16 (bf16 sublane packing),
        # capped at 1024 rows.
        budget_per_buffer = 8 * 1024 * 1024
        tm_cap = max(16, min(1024, (budget_per_buffer // bytes_per_row) // 16 * 16))
        if M <= 16:
            tm = _round_up(M, 8)
        else:
            # Megacore (v7x has 2 TCs): force >= 2 blocks and an even block count so the
            # "parallel" grid axis shards evenly across both cores.
            n_blocks = max(2, pl.cdiv(M, tm_cap))
            if n_blocks % 2 == 1:
                n_blocks += 1
            tm = min(tm_cap, _round_up(pl.cdiv(M, n_blocks), 16))
    else:
        tm = max(8, (tm // 8) * 8)
        tm = min(tm, _round_up(M, 8))

    grid_m = pl.cdiv(M, tm)

    # Scoped-VMEM limit covering the double-buffered working set (weight block pads to
    # 128 lanes in VMEM); clamp to [32 MiB, 64 MiB] (v7x physical ceiling).
    working_set = 2 * (tm * wide_bytes_per_row
                       + tm * 128 * w.dtype.itemsize
                       + 8 * 128 * 4)
    vmem_limit = int(min(64 * 1024 * 1024, max(32 * 1024 * 1024, 2 * working_set)))

    partials = pl.pallas_call(
        functools.partial(_kl_discret_loss_kernel, total_rows=M),
        out_shape=jax.ShapeDtypeStruct((grid_m * 8, 128), jnp.float32),
        grid=(grid_m,),
        in_specs=[
            pl.BlockSpec((tm, Wx), lambda i: (i, 0)),   # output_x rows
            pl.BlockSpec((tm, Wx), lambda i: (i, 0)),   # target_x rows
            pl.BlockSpec((tm, Wy), lambda i: (i, 0)),   # output_y rows
            pl.BlockSpec((tm, Wy), lambda i: (i, 0)),   # target_y rows
            pl.BlockSpec((tm, 1), lambda i: (i, 0)),    # per-row weights
        ],
        out_specs=pl.BlockSpec((8, 128), lambda i: (i, 0)),
        compiler_params=pltpu.CompilerParams(
            dimension_semantics=("parallel",),
            vmem_limit_bytes=vmem_limit,
        ),
        cost_estimate=pl.CostEstimate(
            flops=8 * M * (Wx + Wy),
            transcendentals=2 * M * (Wx + Wy),
            bytes_accessed=(M * wide_bytes_per_row + M * w.dtype.itemsize
                            + grid_m * 8 * 128 * 4),
        ),
    )(ox, tx, oy, ty, w)

    # Tiny final reduction + the PyTorch normalization: mean over batch, / num_joints.
    return jnp.sum(partials) / (N * K)


def kl_discret_loss_ref(output_x, output_y, target_x, target_y, target_weight):
    """Pure-JAX reference matching the PyTorch forward semantics."""
    def criterion(dec_outs, labels):
        scores = jax.nn.log_softmax(dec_outs, axis=1)
        safe = jnp.where(labels > 0, labels, 1.0)
        kl = jnp.where(labels > 0, labels * (jnp.log(safe) - scores), 0.0)
        return jnp.mean(kl, axis=1)

    num_joints = output_x.shape[1]
    loss = 0.0
    for idx in range(num_joints):
        cxp = output_x[:, idx]
        cyp = output_y[:, idx]
        cxg = target_x[:, idx]
        cyg = target_y[:, idx]
        weight = target_weight[:, idx]
        loss = loss + jnp.mean(criterion(cxp, cxg) * weight)
        loss = loss + jnp.mean(criterion(cyp, cyg) * weight)
    return loss / num_joints


if __name__ == "__main__":
    key = jax.random.PRNGKey(0)
    k1, k2, k3, k4, k5 = jax.random.split(key, 5)

    N, K = 8, 17          # batch, num joints (SimCC-style pose head)
    Wx, Wy = 384, 512     # SimCC bin counts (lane-dense multiples of 128)

    output_x = jax.random.normal(k1, (N, K, Wx), jnp.float32)
    output_y = jax.random.normal(k2, (N, K, Wy), jnp.float32)
    # Soft targets are per-row probability distributions (Gaussian-smoothed labels in practice).
    target_x = jax.nn.softmax(2.0 * jax.random.normal(k3, (N, K, Wx), jnp.float32), axis=-1)
    target_y = jax.nn.softmax(2.0 * jax.random.normal(k4, (N, K, Wy), jnp.float32), axis=-1)
    # Some joints invisible -> weight 0.
    target_weight = (jax.random.uniform(k5, (N, K)) > 0.2).astype(jnp.float32)

    ref = kl_discret_loss_ref(output_x, output_y, target_x, target_y, target_weight)

    # Explicit tm=64 -> grid of 3, masked partial last block (M=136, no padding copies).
    loss_a = jax.block_until_ready(
        kl_discret_loss_pallas(output_x, output_y, target_x, target_y,
                               target_weight, tm=64))
    # Default adaptive tiling -> grid of 2 (megacore-friendly).
    loss_b = jax.block_until_ready(
        kl_discret_loss_pallas(output_x, output_y, target_x, target_y, target_weight))

    assert loss_a.shape == ()
    assert jnp.allclose(loss_a, ref, atol=1e-5, rtol=1e-4), (loss_a, ref)
    assert jnp.allclose(loss_b, ref, atol=1e-5, rtol=1e-4), (loss_b, ref)

    # bf16 ingestion path (half the HBM bytes); kernel widens to f32 internally.
    ox_b, oy_b = output_x.astype(jnp.bfloat16), output_y.astype(jnp.bfloat16)
    tx_b, ty_b = target_x.astype(jnp.bfloat16), target_y.astype(jnp.bfloat16)
    ref_b = kl_discret_loss_ref(ox_b.astype(jnp.float32), oy_b.astype(jnp.float32),
                                tx_b.astype(jnp.float32), ty_b.astype(jnp.float32),
                                target_weight)
    loss_c = jax.block_until_ready(
        kl_discret_loss_pallas(ox_b, oy_b, tx_b, ty_b, target_weight))
    assert jnp.allclose(loss_c, ref_b, atol=1e-4, rtol=1e-3), (loss_c, ref_b)

    # Small ragged case (M=20, partial last block) exercising the in-kernel row mask.
    N2, K2, Wx2, Wy2 = 4, 5, 256, 128
    j1, j2, j3, j4, j5 = jax.random.split(jax.random.PRNGKey(1), 5)
    ox2 = jax.random.normal(j1, (N2, K2, Wx2), jnp.float32)
    oy2 = jax.random.normal(j2, (N2, K2, Wy2), jnp.float32)
    tx2 = jax.nn.softmax(jax.random.normal(j3, (N2, K2, Wx2), jnp.float32), axis=-1)
    ty2 = jax.nn.softmax(jax.random.normal(j4, (N2, K2, Wy2), jnp.float32), axis=-1)
    tw2 = (jax.random.uniform(j5, (N2, K2)) > 0.3).astype(jnp.float32)
    ref2 = kl_discret_loss_ref(ox2, oy2, tx2, ty2, tw2)
    loss_d = jax.block_until_ready(kl_discret_loss_pallas(ox2, oy2, tx2, ty2, tw2))
    assert jnp.allclose(loss_d, ref2, atol=1e-5, rtol=1e-4), (loss_d, ref2)

    print("KERNEL_OK")
</pallas_src>

<mosaic_0001>
module attributes {stable_mosaic.version = 11 : i64} {
  func.func @_kl_discret_loss_kernel(%arg0: i32, %arg1: memref<64x384xf32, #tpu.memory_space<vmem>>, %arg2: memref<64x384xf32, #tpu.memory_space<vmem>>, %arg3: memref<64x512xf32, #tpu.memory_space<vmem>>, %arg4: memref<64x512xf32, #tpu.memory_space<vmem>>, %arg5: memref<64x1xf32, #tpu.memory_space<vmem>>, %arg6: memref<8x128xf32, #tpu.memory_space<vmem>>) attributes {dimension_semantics = [#tpu.dimension_semantics<parallel>], iteration_bounds = array<i64: 3>, scalar_prefetch = 0 : i64, scratch_operands = 0 : i64, tpu.core_type = #tpu.core_type<tc>, window_params = [{transform_indices = @transform_0, window_bounds = array<i64: 64, 384>}, {transform_indices = @transform_1, window_bounds = array<i64: 64, 384>}, {transform_indices = @transform_2, window_bounds = array<i64: 64, 512>}, {transform_indices = @transform_3, window_bounds = array<i64: 64, 512>}, {transform_indices = @transform_4, window_bounds = array<i64: 64, 1>}, {transform_indices = @transform_5, window_bounds = array<i64: 8, 128>}]} {
    %c64_i32 = arith.constant 64 : i32
    %0 = arith.muli %arg0, %c64_i32 : i32
    %1 = tpu.iota {dimensions = array<i32: 0>} : vector<64x1xi32>
    %2 = vector.broadcast %0 : i32 to vector<64x1xi32>
    %3 = arith.addi %2, %1 : vector<64x1xi32>
    %c136_i32 = arith.constant 136 : i32
    %4 = vector.broadcast %c136_i32 : i32 to vector<64x1xi32>
    %5 = arith.cmpi slt, %3, %4 : vector<64x1xi32>
    %c0 = arith.constant 0 : index
    %c0_0 = arith.constant 0 : index
    %6 = vector.load %arg5[%c0, %c0_0] : memref<64x1xf32, #tpu.memory_space<vmem>>, vector<64x1xf32>
    %cst = arith.constant 0.000000e+00 : f32
    %7 = vector.broadcast %cst : f32 to vector<64x1xf32>
    %8 = arith.select %5, %6, %7 : vector<64x1xi1>, vector<64x1xf32>
    %c0_1 = arith.constant 0 : index
    %c0_2 = arith.constant 0 : index
    %9 = vector.load %arg1[%c0_1, %c0_2] : memref<64x384xf32, #tpu.memory_space<vmem>>, vector<64x384xf32>
    %c0_3 = arith.constant 0 : index
    %c0_4 = arith.constant 0 : index
    %10 = vector.load %arg2[%c0_3, %c0_4] : memref<64x384xf32, #tpu.memory_space<vmem>>, vector<64x384xf32>
    %cst_5 = arith.constant dense<0xFF800000> : vector<64xf32>
    %11 = vector.multi_reduction <maximumf>, %9, %cst_5 [1] : vector<64x384xf32> to vector<64xf32>
    %12 = vector.shape_cast %11 : vector<64xf32> to vector<64x1xf32>
    %13 = vector.broadcast %12 : vector<64x1xf32> to vector<64x384xf32>
    %14 = arith.subf %9, %13 : vector<64x384xf32>
    %15 = math.exp %14 : vector<64x384xf32>
    %cst_6 = arith.constant dense<0.000000e+00> : vector<64xf32>
    %16 = vector.multi_reduction <add>, %15, %cst_6 [1] : vector<64x384xf32> to vector<64xf32>
    %17 = vector.shape_cast %16 : vector<64xf32> to vector<64x1xf32>
    %18 = math.log %17 : vector<64x1xf32>
    %19 = vector.broadcast %18 : vector<64x1xf32> to vector<64x384xf32>
    %20 = arith.subf %14, %19 : vector<64x384xf32>
    %cst_7 = arith.constant 0.000000e+00 : f32
    %21 = vector.broadcast %cst_7 : f32 to vector<64x384xf32>
    %22 = arith.cmpf ogt, %10, %21 : vector<64x384xf32>
    %cst_8 = arith.constant 1.000000e+00 : f32
    %23 = vector.broadcast %cst_8 : f32 to vector<64x384xf32>
    %24 = arith.select %22, %10, %23 : vector<64x384xi1>, vector<64x384xf32>
    %cst_9 = arith.constant 0.000000e+00 : f32
    %25 = vector.broadcast %cst_9 : f32 to vector<64x384xf32>
    %26 = arith.cmpf ogt, %10, %25 : vector<64x384xf32>
    %27 = vector.broadcast %5 : vector<64x1xi1> to vector<64x384xi1>
    %28 = arith.andi %27, %26 : vector<64x384xi1>
    %29 = math.log %24 : vector<64x384xf32>
    %30 = arith.subf %29, %20 : vector<64x384xf32>
    %31 = arith.mulf %10, %30 : vector<64x384xf32>
    %cst_10 = arith.constant 0.000000e+00 : f32
    %32 = vector.broadcast %cst_10 : f32 to vector<64x384xf32>
    %33 = arith.select %28, %31, %32 : vector<64x384xi1>, vector<64x384xf32>
    %cst_11 = arith.constant dense<0.000000e+00> : vector<64xf32>
    %34 = vector.multi_reduction <add>, %33, %cst_11 [1] : vector<64x384xf32> to vector<64xf32>
    %35 = vector.shape_cast %34 : vector<64xf32> to vector<64x1xf32>
    %36 = arith.mulf %35, %8 : vector<64x1xf32>
    %cst_12 = arith.constant dense<0.000000e+00> : vector<1xf32>
    %37 = vector.multi_reduction <add>, %36, %cst_12 [0] : vector<64x1xf32> to vector<1xf32>
    %38 = vector.shape_cast %37 : vector<1xf32> to vector<1x1xf32>
    %cst_13 = arith.constant 0.00260416674 : f32
    %39 = vector.broadcast %cst_13 : f32 to vector<1x1xf32>
    %40 = arith.mulf %38, %39 : vector<1x1xf32>
    %c0_14 = arith.constant 0 : index
    %c0_15 = arith.constant 0 : index
    %41 = vector.load %arg3[%c0_14, %c0_15] : memref<64x512xf32, #tpu.memory_space<vmem>>, vector<64x512xf32>
    %c0_16 = arith.constant 0 : index
    %c0_17 = arith.constant 0 : index
    %42 = vector.load %arg4[%c0_16, %c0_17] : memref<64x512xf32, #tpu.memory_space<vmem>>, vector<64x512xf32>
    %cst_18 = arith.constant dense<0xFF800000> : vector<64xf32>
    %43 = vector.multi_reduction <maximumf>, %41, %cst_18 [1] : vector<64x512xf32> to vector<64xf32>
    %44 = vector.shape_cast %43 : vector<64xf32> to vector<64x1xf32>
    %45 = vector.broadcast %44 : vector<64x1xf32> to vector<64x512xf32>
    %46 = arith.subf %41, %45 : vector<64x512xf32>
    %47 = math.exp %46 : vector<64x512xf32>
    %cst_19 = arith.constant dense<0.000000e+00> : vector<64xf32>
    %48 = vector.multi_reduction <add>, %47, %cst_19 [1] : vector<64x512xf32> to vector<64xf32>
    %49 = vector.shape_cast %48 : vector<64xf32> to vector<64x1xf32>
    %50 = math.log %49 : vector<64x1xf32>
    %51 = vector.broadcast %50 : vector<64x1xf32> to vector<64x512xf32>
    %52 = arith.subf %46, %51 : vector<64x512xf32>
    %cst_20 = arith.constant 0.000000e+00 : f32
    %53 = vector.broadcast %cst_20 : f32 to vector<64x512xf32>
    %54 = arith.cmpf ogt, %42, %53 : vector<64x512xf32>
    %cst_21 = arith.constant 1.000000e+00 : f32
    %55 = vector.broadcast %cst_21 : f32 to vector<64x512xf32>
    %56 = arith.select %54, %42, %55 : vector<64x512xi1>, vector<64x512xf32>
    %cst_22 = arith.constant 0.000000e+00 : f32
    %57 = vector.broadcast %cst_22 : f32 to vector<64x512xf32>
    %58 = arith.cmpf ogt, %42, %57 : vector<64x512xf32>
    %59 = vector.broadcast %5 : vector<64x1xi1> to vector<64x512xi1>
    %60 = arith.andi %59, %58 : vector<64x512xi1>
    %61 = math.log %56 : vector<64x512xf32>
    %62 = arith.subf %61, %52 : vector<64x512xf32>
    %63 = arith.mulf %42, %62 : vector<64x512xf32>
    %cst_23 = arith.constant 0.000000e+00 : f32
    %64 = vector.broadcast %cst_23 : f32 to vector<64x512xf32>
    %65 = arith.select %60, %63, %64 : vector<64x512xi1>, vector<64x512xf32>
    %cst_24 = arith.constant dense<0.000000e+00> : vector<64xf32>
    %66 = vector.multi_reduction <add>, %65, %cst_24 [1] : vector<64x512xf32> to vector<64xf32>
    %67 = vector.shape_cast %66 : vector<64xf32> to vector<64x1xf32>
    %68 = arith.mulf %67, %8 : vector<64x1xf32>
    %cst_25 = arith.constant dense<0.000000e+00> : vector<1xf32>
    %69 = vector.multi_reduction <add>, %68, %cst_25 [0] : vector<64x1xf32> to vector<1xf32>
    %70 = vector.shape_cast %69 : vector<1xf32> to vector<1x1xf32>
    %cst_26 = arith.constant 0.001953125 : f32
    %71 = vector.broadcast %cst_26 : f32 to vector<1x1xf32>
    %72 = arith.mulf %70, %71 : vector<1x1xf32>
    %73 = arith.addf %40, %72 : vector<1x1xf32>
    %cst_27 = arith.constant 9.765625E-4 : f32
    %74 = vector.broadcast %cst_27 : f32 to vector<1x1xf32>
    %75 = arith.mulf %73, %74 : vector<1x1xf32>
    %76 = vector.shape_cast %75 : vector<1x1xf32> to vector<1x1xf32>
    %77 = vector.broadcast %76 : vector<1x1xf32> to vector<8x128xf32>
    %c0_28 = arith.constant 0 : index
    %c0_29 = arith.constant 0 : index
    %78 = vector.load %arg6[%c0_28, %c0_29] : memref<8x128xf32, #tpu.memory_space<vmem>>, vector<8x128xf32>
    tpu.vector_store %arg6[%c0_28, %c0_29], %77 {strides = array<i32>} : memref<8x128xf32, #tpu.memory_space<vmem>>, vector<8x128xf32>,
    return
  }
  func.func @transform_0(%arg0: i32) -> (i32, i32) {
    %c0_i32 = arith.constant 0 : i32
    %c0_i32_0 = arith.constant 0 : i32
    return %arg0, %c0_i32 : i32, i32
  }
  func.func @transform_1(%arg0: i32) -> (i32, i32) {
    %c0_i32 = arith.constant 0 : i32
    %c0_i32_0 = arith.constant 0 : i32
    return %arg0, %c0_i32 : i32, i32
  }
  func.func @transform_2(%arg0: i32) -> (i32, i32) {
    %c0_i32 = arith.constant 0 : i32
    %c0_i32_0 = arith.constant 0 : i32
    return %arg0, %c0_i32 : i32, i32
  }
  func.func @transform_3(%arg0: i32) -> (i32, i32) {
    %c0_i32 = arith.constant 0 : i32
    %c0_i32_0 = arith.constant 0 : i32
    return %arg0, %c0_i32 : i32, i32
  }
  func.func @transform_4(%arg0: i32) -> (i32, i32) {
    %c0_i32 = arith.constant 0 : i32
    %c0_i32_0 = arith.constant 0 : i32
    return %arg0, %c0_i32 : i32, i32
  }
  func.func @transform_5(%arg0: i32) -> (i32, i32) {
    %c0_i32 = arith.constant 0 : i32
    %c0_i32_0 = arith.constant 0 : i32
    return %arg0, %c0_i32 : i32, i32
  }
}

</mosaic_0001>

<bundles_post_ra>
// kernel: tpu_custom_call.1
= control target key start
LH: loop header
LB: loop body
LE: loop exit
PB: predicated region body
PF: predicated region fallthrough
CT: control target
= control target key end

     0   :  { %10 = vsyncpa [#allocation3], 0  ;;  %s4600_s0 = inlined_call_operand.hbm [shape: f32[136,384], index: 0, kind: input, shape index: {}]   ;;  %s4601_s1 = inlined_call_operand.hbm [shape: f32[136,384], index: 1, kind: input, shape index: {}]   ;;  %s4602_s2 = inlined_call_operand.hbm [shape: f32[136,512], index: 2, kind: input, shape index: {}]   ;;  %s4603_s3 = inlined_call_operand.hbm [shape: f32[136,512], index: 3, kind: input, shape index: {}]   ;;  %s4604_s4 = inlined_call_operand.vmem [shape: f32[136,1], index: 4, kind: input, shape index: {}]   ;;  %s4605_s5 = inlined_call_operand.hbm [shape: f32[24,128], index: 5, kind: output, shape index: {}]  }
   0x1   :  { %12 = vsyncpa [#allocation3 + $0x1], 0 }
   0x2   :  { %13 = vsyncpa [#allocation6], 0 }
   0x3   :  { %15 = vsyncpa [#allocation6 + $0x1], 0 }
   0x4   :  { %16 = vsyncpa [#allocation9], 0 }
   0x5   :  { %18 = vsyncpa [#allocation9 + $0x1], 0 }
   0x6   :  { %19 = vsyncpa [#allocation4], 0 }
   0x7   :  { %21 = vsyncpa [#allocation4 + $0x1], 0  ;;  %s2378_s18 = smov 0   ;;  %s2380_s19 = smov 0  }
   0x8   :  { %s2382_s20 = smov 0   ;;  %s2384_s21 = smov 0  }
   0x9 LB: > { %s2399_s22 = sadd.s32 4294967295, %s2332_s21   ;;  %s1780_s23 = sadd.s32 4294967294, %s2332_s21   ;;  %s2332_s21 = sphi %s2384_s21, %s5254_s21   ;;  %s2328_s20 = sphi %s2382_s20, %s5253_s20   ;;  %s2324_s19 = sphi %s2380_s19, %s5252_s19   ;;  %s2320_s18 = sphi %s2378_s18, %s5251_s18  }
   0xa   : > { %s2403_s24 = sadd.s32 1, %s2332_s21   ;;  %s34_s25 = sadd.s32 1, %s2328_s20 }
   0xb   : > { %s31_s26 = ssub.s32 %s2332_s21, %s2403_s24  ;;  %p41_p0 = scmp.ne.s32.totalorder %s2328_s20, %s2324_s19 }
   0xc   : > { %p32_p1 = scmp.eq.s32.totalorder %s31_s26, 0  ;;  %p42_p2 = scmp.eq.s32.totalorder %s2332_s21, 0 }
   0xd   : > { %p47_p3 = scmp.ne.s32.totalorder %s2324_s19, %s2320_s18  ;;  %p48_p4 = scmp.eq.s32.totalorder %s2399_s22, 0 }
   0xe   : > { %s2415_s27 = scalar_select %p32_p1, %s2328_s20, %s34_s25  }
   0xf   : > { %p2417_p5 = por %p42_p2, %p41_p0  ;;  %p2421_p6 = por %p48_p4, %p47_p3 }
  0x10   : > { %p175_p7 = scmp.eq.s32.totalorder %s2399_s22, 2  ;;  %p181_p8 = scmp.eq.s32.totalorder %s1780_s23, 2 }
  0x11   : > { %p1782_p11 = scmp.ge.s32.totalorder %s2332_s21, 3 }
  0x12   : > { %p2426_p9 = por %p175_p7, %p41_p0  ;;  %p2430_p10 = por %p181_p8, %p47_p3 }
  0x13   : > { %197 = sbr.rel (%p1782_p11) target bundleno = 168 (0xa8), region = 16 }
  0x14   : > { %s4816_s30 = scalar_select %p2426_p9, 1, 0 }
  0x15   : > { %s4817_s6 = scalar_select %p2430_p10, 1, 0 }
  0x1a   : > { %200 = sbr.rel (!%p2417_p5) target bundleno = 62 (0x3e), region = 20  ;;  %s201_s7 = sand.u32 (%p2417_p5), 1, %s2328_s20  }
  0x1b   : > { %s1783_s8 = sshll.u32 (%p2417_p5), %s2332_s21, 3  ;;  %s1832_s9 = smul.u32 (%p2417_p5), 192, %s201_s7 }
  0x1c   : > { %s207_s10 = ssub.s32 (%p2417_p5), 17, %s1783_s8  ;;  %s2442_s13 = scalar_lea.sflag (%p2417_p5), [#allocation3], %s201_s7 }
  0x1d   : > { %p208_p12 = scmp.lt.s32.totalorder (%p2417_p5), %s207_s10, 8  ;;  %s205_s14 = scalar_lea.vmem (%p2417_p5), [#allocation2], %s1832_s9 }
  0x21   : > { %s5256_s10 = smov (!%p208_p12, %s207_s10), 8 }
  0x22   : > { %s2439_s11 = smul.u32 384, %s5256_s10 }
  0x24   : > { %s213_s12 = ssub.s32 3072, %s2439_s11 }
  0x25   : > { %214 = vsyncadd %s2442_s13, %s213_s12  ;;  %p1786_p13 = scmp.ne.s32.totalorder %s2439_s11, 0  ;;  %s1833_s15 = smul.u32 3072, %s2332_s21 }
  0x26   : > { %s220_s16 = sshll.u32 %s205_s14, 4  ;;  %s2150_s9 = scalar_lea.hbm %s4600_s0, 6528  ;;  %s2452_s16 = int_to_ptr.vmem [resolvable:$true] %s220_s16 }
  0x27   : > { %s2450_s25 = scalar_lea.hbm %s4600_s0, %s1833_s15 }
  0x28   : > { %s2146_s26 = scalar_lea.hbm %s2450_s25, %s2439_s11  ;;  %p2151_p3 = scmp.lt.u32.totalorder %s2450_s25, %s4600_s0 }
  0x29   : > { %p2147_p0 = scmp.ne.s32.totalorder %s2450_s25, %s2146_s26  ;;  %p2152_p4 = scmp.lt.u32.totalorder %s2150_s9, %s2146_s26 }
  0x2a   : > { %p2154_p8 = scmp.lt.u32.totalorder %s2146_s26, %s2450_s25 }
  0x2b   : > { %p2148_p1 = pnand %p2147_p0, %p1786_p13  ;;  %p2153_p7 = por %p2152_p4, %p2151_p3 }
  0x2d   : > { %p2149_p2 = pneg %p2148_p1  ;;  %p2155_p11 = por %p2154_p8, %p2153_p7 }
  0x2f   : > { %p2156_p12 = pnand %p2155_p11, %p2149_p2 }
  0x31   : > { %2159 = shalt.err (!%p2156_p12)
}
  0x32   : > { %s2160_s14 = scalar_lea.vmem %s2452_s16, %s2439_s11  ;;  %s2334_s15 = smov [#allocation2]  }
  0x33   : > { %p2161_p0 = scmp.ne.s32.totalorder %s2452_s16, %s2160_s14  ;;  %s2164_s17 = sshll.u32 %s2334_s15, 4  ;;  %s2165_s17 = int_to_ptr.vmem [resolvable:$false] %s2164_s17 }
  0x34   : > { %s2166_s23 = scalar_lea.vmem %s2165_s17, 6144  ;;  %p2167_p9 = scmp.lt.s32.totalorder %s2452_s16, %s2165_s17 }
  0x35   : > { %p2162_p1 = pnand %p2161_p0, %p1786_p13  ;;  %p2168_p3 = scmp.lt.s32.totalorder %s2166_s23, %s2160_s14 }
  0x37   : > { %p2163_p10 = pneg %p2162_p1  ;;  %p2169_p4 = por %p2168_p3, %p2167_p9 }
  0x39   : > { %p2170_p7 = pnand %p2169_p4, %p2163_p10 }
  0x3b   : > { %2173 = shalt.err (!%p2170_p7)
}
  0x3c   : > { %s2335_s26 = smov 384   ;;  %s2336_s7 = smov 24  }
  0x3d   : > { %226 = dma.hbm_to_vmem [thread:$0]  (%p1786_p13), %s2450_s25, %s2439_s11, %s2452_s16, %s2442_s13, %s2335_s26, %s2335_s26, %s2336_s7  }
  0x3e PF: > { %229 = sbr.rel (!%p2417_p5) target bundleno = 98 (0x62), region = 24  ;;  %s230_s8 = sand.u32 (%p2417_p5), 1, %s2332_s21  }
  0x3f   : > { %s232_s9 = sand.u32 (%p2417_p5), 1, %s2328_s20   ;;  %s1790_s12 = sshll.u32 (%p2417_p5), %s2332_s21, 3 }
  0x40   : > { %s1834_s10 = smul.u32 (%p2417_p5), 192, %s232_s9  ;;  %s236_s14 = ssub.s32 (%p2417_p5), 17, %s1790_s12 }
  0x41   : > { %p237_p9 = scmp.lt.s32.totalorder (%p2417_p5), %s236_s14, 8  ;;  %s2487_s23 = scalar_lea.sflag (%p2417_p5), [#allocation6], %s230_s8 }
  0x42   : > { %s234_s11 = scalar_lea.vmem (%p2417_p5), [#allocation5], %s1834_s10 }
  0x45   : > { %s5258_s14 = smov (!%p237_p9, %s236_s14), 8 }
  0x46   : > { %s2484_s15 = smul.u32 384, %s5258_s14 }
  0x48   : > { %s242_s17 = ssub.s32 3072, %s2484_s15 }
  0x49   : > { %243 = vsyncadd %s2487_s23, %s242_s17  ;;  %p1793_p10 = scmp.ne.s32.totalorder %s2484_s15, 0  ;;  %s1835_s13 = smul.u32 3072, %s2332_s21 }
  0x4a   : > { %s249_s16 = sshll.u32 %s234_s11, 4  ;;  %s2178_s12 = scalar_lea.hbm %s4601_s1, 6528  ;;  %s2497_s16 = int_to_ptr.vmem [resolvable:$true] %s249_s16 }
  0x4b   : > { %s2495_s7 = scalar_lea.hbm %s4601_s1, %s1835_s13 }
  0x4c   : > { %s2174_s8 = scalar_lea.hbm %s2495_s7, %s2484_s15  ;;  %p2179_p11 = scmp.lt.u32.totalorder %s2495_s7, %s4601_s1 }
  0x4d   : > { %p2175_p13 = scmp.ne.s32.totalorder %s2495_s7, %s2174_s8  ;;  %p2180_p12 = scmp.lt.u32.totalorder %s2178_s12, %s2174_s8 }
  0x4e   : > { %p2182_p1 = scmp.lt.u32.totalorder %s2174_s8, %s2495_s7 }
  0x4f   : > { %p2176_p2 = pnand %p2175_p13, %p1793_p10  ;;  %p2181_p0 = por %p2180_p12, %p2179_p11 }
  0x51   : > { %p2177_p8 = pneg %p2176_p2  ;;  %p2183_p3 = por %p2182_p1, %p2181_p0 }
  0x53   : > { %p2184_p4 = pnand %p2183_p3, %p2177_p8 }
  0x55   : > { %2187 = shalt.err (!%p2184_p4)
}
  0x56   : > { %s2188_s11 = scalar_lea.vmem %s2497_s16, %s2484_s15  ;;  %s2337_s13 = smov [#allocation5]  }
  0x57   : > { %p2189_p7 = scmp.ne.s32.totalorder %s2497_s16, %s2188_s11  ;;  %s2192_s25 = sshll.u32 %s2337_s13, 4  ;;  %s2193_s25 = int_to_ptr.vmem [resolvable:$false] %s2192_s25 }
  0x58   : > { %s2194_s26 = scalar_lea.vmem %s2193_s25, 6144  ;;  %p2195_p2 = scmp.lt.s32.totalorder %s2497_s16, %s2193_s25 }
  0x59   : > { %p2190_p9 = pnand %p2189_p7, %p1793_p10  ;;  %p2196_p11 = scmp.lt.s32.totalorder %s2194_s26, %s2188_s11 }
  0x5b   : > { %p2191_p13 = pneg %p2190_p9  ;;  %p2197_p12 = por %p2196_p11, %p2195_p2 }
  0x5d   : > { %p2198_p0 = pnand %p2197_p12, %p2191_p13 }
  0x5f   : > { %2201 = shalt.err (!%p2198_p0)
}
  0x60   : > { %s2338_s8 = smov 384   ;;  %s2339_s9 = smov 24  }
  0x61   : > { %255 = dma.hbm_to_vmem [thread:$0]  (%p1793_p10), %s2495_s7, %s2484_s15, %s2497_s16, %s2487_s23, %s2338_s8, %s2338_s8, %s2339_s9  }
  0x62 PF: > { %258 = sbr.rel (!%p2417_p5) target bundleno = 133 (0x85), region = 28  ;;  %s259_s10 = sand.u32 (%p2417_p5), 1, %s2332_s21  }
  0x63   : > { %s261_s12 = sand.u32 (%p2417_p5), 1, %s2328_s20   ;;  %s1798_s17 = sshll.u32 (%p2417_p5), %s2332_s21, 3 }
  0x64   : > { %s1797_s14 = sshll.u32 (%p2417_p5), %s261_s12, 8  ;;  %s265_s11 = ssub.s32 (%p2417_p5), 17, %s1798_s17 }
  0x65   : > { %p266_p8 = scmp.lt.s32.totalorder (%p2417_p5), %s265_s11, 8  ;;  %s2532_s26 = scalar_lea.sflag (%p2417_p5), [#allocation6], %s259_s10 }
  0x66   : > { %s263_s15 = scalar_lea.vmem (%p2417_p5), [#allocation7], %s1797_s14 }
  0x69   : > { %s5260_s11 = smov (!%p266_p8, %s265_s11), 8 }
  0x6a   : > { %s2529_s13 = sshll.u32 %s5260_s11, 9 }
  0x6b   : > { %s271_s25 = ssub.s32 4096, %s2529_s13 }
  0x6c   : > { %272 = vsyncadd %s2532_s26, %s271_s25  ;;  %p1801_p10 = scmp.ne.s32.totalorder %s2529_s13, 0  ;;  %s1828_s23 = sshll.u32 %s2332_s21, 12 }
  0x6d   : > { %s2540_s8 = scalar_lea.hbm %s4602_s2, %s1828_s23  ;;  %s278_s9 = sshll.u32 %s263_s15, 4  ;;  %s2542_s9 = int_to_ptr.vmem [resolvable:$true] %s278_s9 }
  0x6e   : > { %s2202_s10 = scalar_lea.hbm %s2540_s8, %s2529_s13  ;;  %s2206_s17 = scalar_lea.hbm %s4602_s2, 8704 }
  0x6f   : > { %p2203_p1 = scmp.ne.s32.totalorder %s2540_s8, %s2202_s10  ;;  %p2207_p7 = scmp.lt.u32.totalorder %s2540_s8, %s4602_s2 }
  0x70   : > { %p2208_p9 = scmp.lt.u32.totalorder %s2206_s17, %s2202_s10  ;;  %p2210_p2 = scmp.lt.u32.totalorder %s2202_s10, %s2540_s8 }
  0x71   : > { %p2204_p3 = pnand %p2203_p1, %p1801_p10 }
  0x72   : > { %p2209_p13 = por %p2208_p9, %p2207_p7 }
  0x73   : > { %p2205_p4 = pneg %p2204_p3 }
  0x74   : > { %p2211_p11 = por %p2210_p2, %p2209_p13 }
  0x76   : > { %p2212_p12 = pnand %p2211_p11, %p2205_p4 }
  0x78   : > { %2215 = shalt.err (!%p2212_p12)
}
  0x79   : > { %s2216_s15 = scalar_lea.vmem %s2542_s9, %s2529_s13  ;;  %s2340_s23 = smov [#allocation7]  }
  0x7a   : > { %p2217_p0 = scmp.ne.s32.totalorder %s2542_s9, %s2216_s15  ;;  %s2220_s16 = sshll.u32 %s2340_s23, 4  ;;  %s2221_s16 = int_to_ptr.vmem [resolvable:$false] %s2220_s16 }
  0x7b   : > { %s2222_s7 = scalar_lea.vmem %s2221_s16, 8192  ;;  %p2223_p3 = scmp.lt.s32.totalorder %s2542_s9, %s2221_s16 }
  0x7c   : > { %p2218_p8 = pnand %p2217_p0, %p1801_p10  ;;  %p2224_p7 = scmp.lt.s32.totalorder %s2222_s7, %s2216_s15 }
  0x7e   : > { %p2219_p1 = pneg %p2218_p8  ;;  %p2225_p9 = por %p2224_p7, %p2223_p3 }
  0x80   : > { %p2226_p13 = pnand %p2225_p9, %p2219_p1 }
  0x82   : > { %2229 = shalt.err (!%p2226_p13)
}
  0x83   : > { %s2341_s10 = smov 512   ;;  %s2342_s12 = smov 32  }
  0x84   : > { %284 = dma.hbm_to_vmem [thread:$0]  (%p1801_p10), %s2540_s8, %s2529_s13, %s2542_s9, %s2532_s26, %s2341_s10, %s2341_s10, %s2342_s12  }
  0x85 PF: > { %287 = sbr.rel (!%p2417_p5) target bundleno = 168 (0xa8), region = 32  ;;  %s288_s14 = sand.u32 (%p2417_p5), 1, %s2328_s20  }
  0x86   : > { %s1807_s17 = sshll.u32 (%p2417_p5), %s2332_s21, 3  ;;  %s1806_s11 = sshll.u32 (%p2417_p5), %s288_s14, 8 }
  0x87   : > { %s294_s25 = ssub.s32 (%p2417_p5), 17, %s1807_s17  ;;  %s2576_s16 = scalar_lea.sflag (%p2417_p5), [#allocation9], %s288_s14 }
  0x88   : > { %p295_p4 = scmp.lt.s32.totalorder (%p2417_p5), %s294_s25, 8  ;;  %s292_s13 = scalar_lea.vmem (%p2417_p5), [#allocation8], %s1806_s11 }
  0x8c   : > { %s5262_s25 = smov (!%p295_p4, %s294_s25), 8 }
  0x8d   : > { %s2573_s15 = sshll.u32 %s5262_s25, 9 }
  0x8e   : > { %s300_s23 = ssub.s32 4096, %s2573_s15 }
  0x8f   : > { %301 = vsyncadd %s2576_s16, %s300_s23  ;;  %p1810_p5 = scmp.ne.s32.totalorder %s2573_s15, 0  ;;  %s1831_s28 = sshll.u32 %s2332_s21, 12 }
  0x90   : > { %s2584_s9 = scalar_lea.hbm %s4603_s3, %s1831_s28  ;;  %s307_s7 = sshll.u32 %s292_s13, 4  ;;  %s2586_s7 = int_to_ptr.vmem [resolvable:$true] %s307_s7 }
  0x91   : > { %s2230_s10 = scalar_lea.hbm %s2584_s9, %s2573_s15  ;;  %s2234_s17 = scalar_lea.hbm %s4603_s3, 8704 }
  0x92   : > { %p2231_p10 = scmp.ne.s32.totalorder %s2584_s9, %s2230_s10  ;;  %p2235_p12 = scmp.lt.u32.totalorder %s2584_s9, %s4603_s3 }
  0x93   : > { %p2236_p0 = scmp.lt.u32.totalorder %s2234_s17, %s2230_s10  ;;  %p2238_p1 = scmp.lt.u32.totalorder %s2230_s10, %s2584_s9 }
  0x94   : > { %p2232_p2 = pnand %p2231_p10, %p1810_p5 }
  0x95   : > { %p2237_p8 = por %p2236_p0, %p2235_p12 }
  0x96   : > { %p2233_p11 = pneg %p2232_p2 }
  0x97   : > { %p2239_p3 = por %p2238_p1, %p2237_p8 }
  0x99   : > { %p2240_p7 = pnand %p2239_p3, %p2233_p11 }
  0x9b   : > { %2243 = shalt.err (!%p2240_p7)
}
  0x9c   : > { %s2244_s23 = scalar_lea.vmem %s2586_s7, %s2573_s15  ;;  %s2343_s13 = smov [#allocation8]  }
  0x9d   : > { %p2245_p9 = scmp.ne.s32.totalorder %s2586_s7, %s2244_s23  ;;  %s2248_s28 = sshll.u32 %s2343_s13, 4  ;;  %s2249_s28 = int_to_ptr.vmem [resolvable:$false] %s2248_s28 }
  0x9e   : > { %s2250_s26 = scalar_lea.vmem %s2249_s28, 8192  ;;  %p2251_p10 = scmp.lt.s32.totalorder %s2586_s7, %s2249_s28 }
  0x9f   : > { %p2246_p13 = pnand %p2245_p9, %p1810_p5  ;;  %p2252_p2 = scmp.lt.s32.totalorder %s2250_s26, %s2244_s23 }
  0xa1   : > { %p2247_p4 = pneg %p2246_p13  ;;  %p2253_p12 = por %p2252_p2, %p2251_p10 }
  0xa3   : > { %p2254_p0 = pnand %p2253_p12, %p2247_p4 }
  0xa5   : > { %2257 = shalt.err (!%p2254_p0)
}
  0xa6   : > { %s2344_s8 = smov 512   ;;  %s2345_s10 = smov 32  }
  0xa7   : > { %313 = dma.hbm_to_vmem [thread:$0]  (%p1810_p5), %s2584_s9, %s2573_s15, %s2586_s7, %s2576_s16, %s2344_s8, %s2344_s8, %s2345_s10  }
  0xa8 PF: > { %p1815_p11 = scmp.ge.s32.totalorder %s2332_s21, 1  ;;  %p332_p8 = scmp.lt.s32.totalorder %s2332_s21, 4 }
  0xaa   : > { %p333_p1 = pnand %p1815_p11, %p332_p8 }
  0xac   : > { %336 = sbr.rel (%p333_p1) target bundleno = 919 (0x397), region = 40 }
  0xb3   : > { %s2616_s12 = sand.u32 1, %s2324_s19  }
  0xb4   : > { %s1836_s14 = smul.u32 192, %s2616_s12  ;;  %s339_s17 = scalar_lea.sflag [#allocation3], %s2616_s12 }
  0xb6   : > { %s2620_s11 = scalar_lea.vmem [#allocation2], %s1836_s14 }
  0xb7   : > { %2303 = dma.done.wait (%p2421_p6), %s339_s17, 3072  }
  0xb8   : > { %2305 = vsyncadd (%p2421_p6), %s339_s17, 4294964224  ;;  %s347_s15 = sand.u32 1, %s2399_s22   ;;  %s2627_s9 = scalar_lea.vmem [#allocation5], %s1836_s14 }
  0xb9   : > { %s348_s16 = scalar_lea.sflag [#allocation6], %s347_s15 }
  0xba   : > { %2307 = dma.done.wait (%p2421_p6), %s348_s16, 7168  }
  0xbb   : > { %2309 = vsyncadd (%p2421_p6), %s348_s16, 4294960128  ;;  %s1816_s7 = sshll.u32 %s2616_s12, 8  ;;  %s366_s23 = scalar_lea.sflag [#allocation9], %s2616_s12 }
  0xbc   : > { %s2634_s25 = scalar_lea.vmem [#allocation7], %s1816_s7  ;;  %s2637_s13 = scalar_lea.vmem [#allocation8], %s1816_s7 }
  0xbd   : > { %2311 = dma.done.wait (%p2421_p6), %s366_s23, 4096  }
  0xbe   : > { %2313 = vsyncadd (%p2421_p6), %s366_s23, 4294963200  ;;  %v2644_v0 = vld [vmem:[%s2620_s11 + $0x18] sm:$0xff]  ;;  %v2647_v1 = vld [vmem:[%s2620_s11 + $0x20] sm:$0xff]  ;;  %s1821_s29 = sshll.u32 %s2399_s22, 6  ;;  %s1819_s28 = sshll.u32 %s2399_s22, 3 }
  0xbf   : > { %v2650_v2 = vld [vmem:[%s2620_s11 + $0x28] sm:$0xff]  ;;  %v553_v3 = vmax.f32 %v2644_v0, %v2647_v1  ;;  %v2655_v4 = vld [vmem:[%s2620_s11] sm:$0xff]  ;;  %v2661_v6 = vld [vmem:[%s2620_s11 + $0x10] sm:$0xff]  ;;  %p449_p6 = scmp.lt.s32.totalorder %s1819_s28, 16  ;;  %s1818_s17 = sshll.u32 %s2616_s12, 3 }
  0xc0   : > { %v2658_v5 = vld [vmem:[%s2620_s11 + $0x8] sm:$0xff]  ;;  %v2666_v8 = vld [vmem:[%s2620_s11 + $0x30] sm:$0xff]  ;;  %v2669_v9 = vld [vmem:[%s2620_s11 + $0x38] sm:$0xff]  ;;  %s1823_s16 = sshll.u32 %s2399_s22, 7  ;;  %s1619_s23 = scalar_lea.sflag [#allocation4], %s2616_s12 }
  0xc1   : > { %v549_v7 = vmax.f32 %v2655_v4, %v2658_v5  ;;  %v2672_v10 = vld [vmem:[%s2620_s11 + $0x40] sm:$0xff]  ;;  %v554_v11 = vmax.f32 %v553_v3, %v2650_v2  ;;  %v557_v12 = vmax.f32 %v2666_v8, %v2669_v9  ;;  %v2681_v14 = vld [vmem:[%s2634_s25 + $0x8] sm:$0xff]  ;;  %v2684_v15 = vld [vmem:[%s2634_s25 + $0x10] sm:$0xff]  ;;  %s5264_s28 = smov (!%p449_p6, %s1819_s28), 16  ;;  %p5249_p3 = scmp.ne.s32.totalorder %s4816_s30, 0 }
  0xc2   : > { %v2678_v13 = vld [vmem:[%s2634_s25] sm:$0xff]  ;;  %v2693_v19 = vld [vmem:[%s2634_s25 + $0x28] sm:$0xff]  ;;  %v2697_v21 = vld [vmem:[%s2634_s25 + $0x30] sm:$0xff]  ;;  %s1820_s26 = sshll.u32 %s5264_s28, 3 }
  0xc3   : > { %v550_v16 = vmax.f32 %v549_v7, %v2661_v6  ;;  %v1060_v17 = vmax.f32 %v2678_v13, %v2681_v14  ;;  %v2690_v18 = vld [vmem:[%s2634_s25 + $0x20] sm:$0xff]  ;;  %555 = vmax.xlane.f32.xlu0 %v554_v11  ;;  %v558_v20 = vmax.f32 %v557_v12, %v2672_v10  ;;  %v2705_v24 = vld [vmem:[%s2634_s25 + $0x18] sm:$0xff]  ;;  %v2709_v26 = vld [vmem:[%s2634_s25 + $0x48] sm:$0xff]  ;;  %s4510_s14 = scalar_lea.vmem %s4604_s4, %s1820_s26 }
  0xc4   : > { %v1065_v22 = vmax.f32 %v2690_v18, %v2693_v19  ;;  %v2702_v23 = vld [vmem:[%s2634_s25 + $0x40] sm:$0xff]  ;;  %v2712_v27 = vld [vmem:[%s2634_s25 + $0x50] sm:$0xff]  ;;  %v2715_v28 = vld [vmem:[%s2634_s25 + $0x38] sm:$0xff] }
  0xc5   : > { %551 = vmax.xlane.f32.xlu1 %v550_v16  ;;  %v1061_v25 = vmax.f32 %v1060_v17, %v2684_v15  ;;  %v2718_v29 = vld [vmem:[%s2634_s25 + $0x58] sm:$0xff]  ;;  %v1070_v30 = vmax.f32 %v2702_v23, %v2709_v26  ;;  %v2723_v31 = vld [vmem:[%s2620_s11 + $0x48] sm:$0xff]  ;;  %v2727_v33 = vld [vmem:[%s2634_s25 + $0x60] sm:$0xff] }
  0xc6   : > { %v1066_v32 = vmax.f32 %v1065_v22, %v2697_v21  ;;  %v2730_v34 = vld [vmem:[%s2634_s25 + $0x68] sm:$0xff]  ;;  %v2733_v35 = vld [vmem:[%s2634_s25 + $0x70] sm:$0xff]  ;;  %v2743_v40 = vld [vmem:[%s2634_s25 + $0x80] sm:$0xff] }
  0xc7   : > { %559 = vmax.xlane.f32.xlu0 %v558_v20  ;;  %v1062_v36 = vmax.f32 %v1061_v25, %v2705_v24  ;;  %v1071_v37 = vmax.f32 %v1070_v30, %v2712_v27  ;;  %v2738_v38 = vld [vmem:[%s2620_s11 + $0x50] sm:$0xff]  ;;  %v1075_v39 = vmax.f32 %v2727_v33, %v2730_v34  ;;  %v2746_v41 = vld [vmem:[%s2634_s25 + $0x88] sm:$0xff]  ;;  %v2749_v42 = vld [vmem:[%s2634_s25 + $0x78] sm:$0xff] }
  0xc8   : > { %v2752_v43 = vld [vmem:[%s2634_s25 + $0x90] sm:$0xff]  ;;  %v1080_v44 = vmax.f32 %v2743_v40, %v2746_v41  ;;  %v2759_v47 = vld [vmem:[%s2634_s25 + $0xa0] sm:$0xff]  ;;  %v1067_v48 = vmax.f32 %v1066_v32, %v2715_v28  ;;  %v2763_v49 = vld [vmem:[%s2620_s11 + $0x58] sm:$0xff]  ;;  %v561_v50 = vmax.f32 %v2723_v31, %v2738_v38 }
  0xc9   : > { %v1072_v45 = vmax.f32 %v1071_v37, %v2718_v29  ;;  %v1076_v46 = vmax.f32 %v1075_v39, %v2733_v35  ;;  %v2768_v51 = vld [vmem:[%s2634_s25 + $0xa8] sm:$0xff]  ;;  %v2772_v53 = vld [vmem:[%s2634_s25 + $0x98] sm:$0xff]  ;;  %v2776_v55 = vld [vmem:[%s2620_s11 + $0x60] sm:$0xff] }
  0xca   : > { %v1081_v54 = vmax.f32 %v1080_v44, %v2752_v43  ;;  %v2779_v56 = vld [vmem:[%s2620_s11 + $0x68] sm:$0xff]  ;;  %v1085_v57 = vmax.f32 %v2759_v47, %v2768_v51  ;;  %v2784_v58 = vld [vmem:[%s2634_s25 + $0xb0] sm:$0xff]  ;;  %v2787_v59 = vld [vmem:[%s2634_s25 + $0xc0] sm:$0xff]  ;;  %v562_v61 = vmax.f32 %v561_v50, %v2763_v49 }
  0xcb   : > { %1063 = vmax.xlane.f32.xlu0 %v1062_v36  ;;  %1073 = vmax.xlane.f32.xlu1 %v1072_v45  ;;  %v1077_v52 = vmax.f32 %v1076_v46, %v2749_v42  ;;  %v2790_v60 = vld [vmem:[%s2634_s25 + $0xc8] sm:$0xff]  ;;  %v2794_v62 = vld [vmem:[%s2620_s11 + $0x70] sm:$0xff]  ;;  %v565_v63 = vmax.f32 %v2776_v55, %v2779_v56  ;;  %v2800_v7 = vld [vmem:[%s2634_s25 + $0xb8] sm:$0xff] }
  0xcc   : > { %v1082_v3 = vmax.f32 %v1081_v54, %v2772_v53  ;;  %v1086_v11 = vmax.f32 %v1085_v57, %v2784_v58  ;;  %v2804_v12 = vld [vmem:[%s2620_s11 + $0x78] sm:$0xff]  ;;  %v2807_v16 = vld [vmem:[%s2620_s11 + $0x80] sm:$0xff]  ;;  %v1090_v17 = vmax.f32 %v2787_v59, %v2790_v60  ;;  %v2812_v20 = vld [vmem:[%s2634_s25 + $0xd0] sm:$0xff] }
  0xcd   : > { %v2815_v22 = vld [vmem:[%s2634_s25 + $0xe0] sm:$0xff]  ;;  %v2818_v25 = vld [vmem:[%s2634_s25 + $0xe8] sm:$0xff]  ;;  %v566_v30 = vmax.f32 %v565_v63, %v2794_v62  ;;  %v569_v32 = vmax.f32 %v2804_v12, %v2807_v16  ;;  %v2828_v39 = vld [vmem:[%s2634_s25 + $0xd8] sm:$0xff] }
  0xce   : > { %4818 = vst [vmem:[#allocation15_spill] sm:$0xff] %v2818_v25  ;;  %v1087_v36 = vmax.f32 %v1086_v11, %v2800_v7  ;;  %v2825_v37 = vld [vmem:[%s2620_s11 + $0x88] sm:$0xff]  ;;  %v1091_v44 = vmax.f32 %v1090_v17, %v2812_v20  ;;  %v1095_v45 = vmax.f32 %v2815_v22, %v2818_v25  ;;  %v2834_v46 = vld [vmem:[%s2620_s11 + $0x90] sm:$0xff]  ;;  %v2845_v57 = vld [vmem:[%s2620_s11 + $0xa0] sm:$0xff] }
  0xcf   : > { %1068 = vmax.xlane.f32.xlu0 %v1067_v48  ;;  %1078 = vmax.xlane.f32.xlu1 %v1077_v52  ;;  %v2837_v48 = vld [vmem:[%s2620_s11 + $0x98] sm:$0xff]  ;;  %v2840_v50 = vld [vmem:[%s2634_s25 + $0xf0] sm:$0xff]  ;;  %v570_v52 = vmax.f32 %v569_v32, %v2825_v37  ;;  %v2854_v11 = vld [vmem:[%s2620_s11 + $0xa8] sm:$0xff] }
  0xd0   : > { %4819 = vst [vmem:[#allocation16_spill] sm:$0xff] %v2840_v50  ;;  %v1092_v54 = vmax.f32 %v1091_v44, %v2828_v39  ;;  %v1096_v63 = vmax.f32 %v1095_v45, %v2840_v50  ;;  %v2857_v17 = vld [vmem:[%s2620_s11 + $0xb0] sm:$0xff]  ;;  %v2864_v44 = vld [vmem:[%s2620_s11 + $0xb8] sm:$0xff]  ;;  %s419_s11 = scalar_lea.vmem [#allocation10], %s1818_s17 }
  0xd1   : > { %s1632_s15 = sshll.u32 %s419_s11, 4  ;;  %s4554_s15 = int_to_ptr.vmem [resolvable:$true] %s1632_s15 }
  0xd3   : > { %563 = vmax.xlane.f32.xlu0 %v562_v61  ;;  %1083 = vmax.xlane.f32.xlu1 %v1082_v3  ;;  %v573_v61 = vmax.f32 %v2834_v46, %v2837_v48  ;;  %v2851_v3 = vld [vmem:[%s2634_s25 + $0xf8] sm:$0xff]  ;;  %s4559_s25 = scalar_lea.hbm %s4605_s5, %s1823_s16 }
  0xd4   : > { %v1097_v32 = vmax.f32 %v1096_v63, %v2851_v3 }
  0xd7   : > { %567 = vmax.xlane.f32.xlu0 %v566_v30  ;;  %1088 = vmax.xlane.f32.xlu1 %v1087_v36  ;;  %v574_v30 = vmax.f32 %v573_v61, %v2845_v57  ;;  %v577_v36 = vmax.f32 %v2854_v11, %v2857_v17 }
  0xd9   : > { %v578_v45 = vmax.f32 %v577_v36, %v2864_v44 }
  0xdb   : > { %571 = vmax.xlane.f32.xlu0 %v570_v52  ;;  %1093 = vmax.xlane.f32.xlu1 %v1092_v54 }
  0xdf   : > { %575 = vmax.xlane.f32.xlu0 %v574_v30  ;;  %1098 = vmax.xlane.f32.xlu1 %v1097_v32 }
  0xe3   : > { %579 = vmax.xlane.f32.xlu1 %v578_v45 }
 0x150   : > { %v556_v50 = vpop.xlane.xlu0 %555 }
 0x151   : > { %v2868_v25 = vsub.f32 %v2644_v0, %v556_v50  ;;  %v2871_v52 = vsub.f32 %v2647_v1, %v556_v50  ;;  %v2874_v54 = vsub.f32 %v2650_v2, %v556_v50 }
 0x152   : > { %v552_v61 = vpop.xlane.xlu1 %551 }
 0x153   : > { %4820 = vst [vmem:[#allocation17_spill] sm:$0xff] %v2868_v25  ;;  %4821 = vst [vmem:[#allocation18_spill] sm:$0xff] %v2871_v52  ;;  %v2877_v63 = vsub.f32 %v2655_v4, %v552_v61  ;;  %v2880_v30 = vsub.f32 %v2658_v5, %v552_v61  ;;  %v2883_v32 = vsub.f32 %v2661_v6, %v552_v61  ;;  %v611_v36 = vmul.f32 1.442695, %v2868_v25 }
 0x154   : > { %4822 = vst [vmem:[#allocation19_spill] sm:$0xff] %v2874_v54  ;;  %v613_v0 = vmul.f32 1.442695, %v2871_v52  ;;  %v615_v1 = vmul.f32 1.442695, %v2874_v54  ;;  %v560_v50 = vpop.xlane.xlu0 %559 }
 0x155   : > { %v605_v45 = vmul.f32 1.442695, %v2877_v63  ;;  %v607_v2 = vmul.f32 1.442695, %v2880_v30  ;;  %1890 = vpow2.f32 %v611_v36  ;;  %v2891_v4 = vsub.f32 %v2666_v8, %v560_v50 }
 0x156   : > { %v2894_v5 = vsub.f32 %v2669_v9, %v560_v50  ;;  %v2897_v6 = vsub.f32 %v2672_v10, %v560_v50  ;;  %1892 = vpow2.f32 %v613_v0  ;;  %v609_v61 = vmul.f32 1.442695, %v2883_v32 }
 0x157   : > { %1894 = vpow2.f32 %v615_v1  ;;  %v617_v54 = vmul.f32 1.442695, %v2891_v4 }
 0x158   : > { %1896 = vpow2.f32 %v605_v45  ;;  %v619_v52 = vmul.f32 1.442695, %v2894_v5  ;;  %v621_v36 = vmul.f32 1.442695, %v2897_v6  ;;  %v1064_v25 = vpop.xlane.xlu0 %1063  ;;  %v1074_v1 = vpop.xlane.xlu1 %1073 }
 0x159   : > { %1898 = vpow2.f32 %v607_v2  ;;  %v2904_v8 = vsub.f32 %v2678_v13, %v1064_v25  ;;  %v2907_v9 = vsub.f32 %v2681_v14, %v1064_v25  ;;  %v2910_v10 = vsub.f32 %v2684_v15, %v1064_v25 }
 0x15a   : > { %1900 = vpow2.f32 %v609_v61  ;;  %v2913_v0 = vsub.f32 %v2705_v24, %v1064_v25 }
 0x15b   : > { %4823 = vst [vmem:[#allocation20_spill] sm:$0xff] %v2907_v9  ;;  %4824 = vst [vmem:[#allocation21_spill] sm:$0xff] %v2910_v10  ;;  %1902 = vpow2.f32 %v617_v54  ;;  %v1132_v45 = vmul.f32 1.442695, %v2904_v8  ;;  %v1134_v50 = vmul.f32 1.442695, %v2907_v9 }
 0x15c   : > { %4825 = vst [vmem:[#allocation22_spill] sm:$0xff] %v2913_v0  ;;  %1904 = vpow2.f32 %v619_v52  ;;  %v1136_v13 = vmul.f32 1.442695, %v2910_v10  ;;  %v1138_v2 = vmul.f32 1.442695, %v2913_v0  ;;  %v1069_v14 = vpop.xlane.xlu0 %1068  ;;  %v2932_v52 = vsub.f32 %v2702_v23, %v1074_v1 }
 0x15d   : > { %1906 = vpow2.f32 %v621_v36  ;;  %v2920_v15 = vsub.f32 %v2690_v18, %v1069_v14  ;;  %v2923_v61 = vsub.f32 %v2693_v19, %v1069_v14  ;;  %v2926_v24 = vsub.f32 %v2697_v21, %v1069_v14 }
 0x15e   : > { %1908 = vpow2.f32 %v1132_v45  ;;  %v2929_v25 = vsub.f32 %v2715_v28, %v1069_v14  ;;  %4830 = vst [vmem:[#allocation27_spill] sm:$0xff] %v2932_v52  ;;  %v2937_v0 = vsub.f32 %v2709_v26, %v1074_v1  ;;  %v2941_v45 = vsub.f32 %v2712_v27, %v1074_v1  ;;  %v1079_v14 = vpop.xlane.xlu1 %1078 }
 0x15f   : > { %4826 = vst [vmem:[#allocation23_spill] sm:$0xff] %v2920_v15  ;;  %4827 = vst [vmem:[#allocation24_spill] sm:$0xff] %v2923_v61  ;;  %v1891_v54 = vpop.eup %1890  ;;  %1910 = vpow2.f32 %v1134_v50  ;;  %v1140_v36 = vmul.f32 1.442695, %v2920_v15  ;;  %v1142_v18 = vmul.f32 1.442695, %v2923_v61  ;;  %v2944_v28 = vsub.f32 %v2718_v29, %v1074_v1 }
 0x160   : > { %4828 = vst [vmem:[#allocation25_spill] sm:$0xff] %v2926_v24  ;;  %4829 = vst [vmem:[#allocation26_spill] sm:$0xff] %v2929_v25  ;;  %v1893_v19 = vpop.eup %1892  ;;  %1912 = vpow2.f32 %v1136_v13  ;;  %v1144_v21 = vmul.f32 1.442695, %v2926_v24  ;;  %v564_v23 = vpop.xlane.xlu0 %563  ;;  %v1146_v15 = vmul.f32 1.442695, %v2929_v25 }
 0x161   : > { %4831 = vst [vmem:[#allocation28_spill] sm:$0xff] %v2937_v0  ;;  %4832 = vst [vmem:[#allocation29_spill] sm:$0xff] %v2941_v45  ;;  %v1895_v50 = vpop.eup %1894  ;;  %1914 = vpow2.f32 %v1138_v2  ;;  %v1148_v26 = vmul.f32 1.442695, %v2932_v52  ;;  %v2949_v13 = vsub.f32 %v2723_v31, %v564_v23  ;;  %v1150_v27 = vmul.f32 1.442695, %v2937_v0 }
 0x162   : > { %4833 = vst [vmem:[#allocation30_spill] sm:$0xff] %v2944_v28  ;;  %v1897_v61 = vpop.eup %1896  ;;  %1916 = vpow2.f32 %v1140_v36  ;;  %v2953_v29 = vsub.f32 %v2738_v38, %v564_v23  ;;  %v1152_v2 = vmul.f32 1.442695, %v2941_v45  ;;  %v1154_v25 = vmul.f32 1.442695, %v2944_v28  ;;  %v1084_v28 = vpop.xlane.xlu1 %1083 }
 0x163   : > { %4834 = vst [vmem:[#allocation31_spill] sm:$0xff] %v2949_v13  ;;  %v1899_v24 = vpop.eup %1898  ;;  %1918 = vpow2.f32 %v1142_v18  ;;  %v2958_v36 = vsub.f32 %v2763_v49, %v564_v23  ;;  %v2961_v31 = vsub.f32 %v2727_v33, %v1079_v14  ;;  %v657_v18 = vadd.f32 %v1893_v19, %v1891_v54 }
 0x164   : > { %4835 = vst [vmem:[#allocation32_spill] sm:$0xff] %v2953_v29  ;;  %v1901_v1 = vpop.eup %1900  ;;  %1920 = vpow2.f32 %v1144_v21  ;;  %v653_v10 = vadd.f32 %v1899_v24, %v1897_v61  ;;  %v623_v38 = vmul.f32 1.442695, %v2949_v13  ;;  %v2965_v21 = vsub.f32 %v2730_v34, %v1079_v14  ;;  %v3579_v13 = vld [vmem:[%s2637_s13 + $0xf8] sm:$0xff] }
 0x165   : > { %4836 = vst [vmem:[#allocation33_spill] sm:$0xff] %v2958_v36  ;;  %v1903_v52 = vpop.eup %1902  ;;  %1922 = vpow2.f32 %v1146_v15  ;;  %4837 = vst [vmem:[#allocation34_spill] sm:$0xff] %v2961_v31  ;;  %v2968_v45 = vsub.f32 %v2733_v35, %v1079_v14  ;;  %v625_v15 = vmul.f32 1.442695, %v2953_v29  ;;  %v658_v23 = vadd.f32 %v1895_v50, %v657_v18 }
 0x166   : > { %v1905_v0 = vpop.eup %1904  ;;  %1924 = vpow2.f32 %v1148_v26  ;;  %4838 = vst [vmem:[#allocation35_spill] sm:$0xff] %v2965_v21  ;;  %v654_v33 = vadd.f32 %v1901_v1, %v653_v10  ;;  %v627_v61 = vmul.f32 1.442695, %v2958_v36  ;;  %v2973_v24 = vsub.f32 %v2749_v42, %v1079_v14  ;;  %v568_v26 = vpop.xlane.xlu0 %567  ;;  %4935 = vst [vmem:[#allocation128_spill] sm:$0xff] %v3579_v13 }
 0x167   : > { %4839 = vst [vmem:[#allocation36_spill] sm:$0xff] %v2968_v45  ;;  %v1907_v49 = vpop.eup %1906  ;;  %1926 = vpow2.f32 %v1150_v27  ;;  %v1156_v34 = vmul.f32 1.442695, %v2961_v31  ;;  %659 = vadd.xlane.f32.xlu1 %v658_v23  ;;  %v2977_v35 = vsub.f32 %v2743_v40, %v1084_v28  ;;  %v1158_v10 = vmul.f32 1.442695, %v2965_v21 }
 0x168   : > { %v1909_v9 = vpop.eup %1908  ;;  %1928 = vpow2.f32 %v1152_v2  ;;  %4840 = vst [vmem:[#allocation37_spill] sm:$0xff] %v2973_v24  ;;  %655 = vadd.xlane.f32.xlu0 %v654_v33  ;;  %v2981_v50 = vsub.f32 %v2746_v41, %v1084_v28  ;;  %v661_v27 = vadd.f32 %v1905_v0, %v1903_v52  ;;  %v2985_v14 = vsub.f32 %v2752_v43, %v1084_v28  ;;  %v1089_v41 = vpop.xlane.xlu1 %1088 }
 0x169   : > { %v1911_v54 = vpop.eup %1910  ;;  %1930 = vpow2.f32 %v1154_v25  ;;  %4841 = vst [vmem:[#allocation38_spill] sm:$0xff] %v2977_v35  ;;  %v1160_v25 = vmul.f32 1.442695, %v2968_v45  ;;  %v1162_v40 = vmul.f32 1.442695, %v2973_v24  ;;  %v2991_v2 = vsub.f32 %v2772_v53, %v1084_v28 }
 0x16a   : > { %v1913_v19 = vpop.eup %1912  ;;  %1932 = vpow2.f32 %v623_v38  ;;  %4842 = vst [vmem:[#allocation39_spill] sm:$0xff] %v2981_v50  ;;  %4843 = vst [vmem:[#allocation40_spill] sm:$0xff] %v2985_v14  ;;  %v662_v18 = vadd.f32 %v1907_v49, %v661_v27  ;;  %v1164_v0 = vmul.f32 1.442695, %v2977_v35  ;;  %v2997_v52 = vsub.f32 %v2776_v55, %v568_v26 }
 0x16b   : > { %v1915_v42 = vpop.eup %1914  ;;  %1934 = vpow2.f32 %v625_v15  ;;  %4844 = vst [vmem:[#allocation41_spill] sm:$0xff] %v2991_v2  ;;  %v1166_v15 = vmul.f32 1.442695, %v2981_v50  ;;  %v3003_v23 = vsub.f32 %v2779_v56, %v568_v26  ;;  %v1168_v28 = vmul.f32 1.442695, %v2985_v14  ;;  %v3358_v50 = vld [vmem:[%s2627_s9 + $0x88] sm:$0xff] }
 0x16c   : > { %v2987_v1 = vpop.eup %1916  ;;  %1936 = vpow2.f32 %v627_v61  ;;  %4845 = vst [vmem:[#allocation42_spill] sm:$0xff] %v2997_v52  ;;  %663 = vadd.xlane.f32.xlu1 %v662_v18  ;;  %v3009_v49 = vsub.f32 %v2794_v62, %v568_v26  ;;  %v1170_v55 = vmul.f32 1.442695, %v2991_v2  ;;  %v3013_v61 = vsub.f32 %v2759_v47, %v1089_v41  ;;  %v1094_v47 = vpop.xlane.xlu1 %1093  ;;  %4894 = vst [vmem:[#allocation87_spill] sm:$0xff] %v3358_v50 }
 0x16d   : > { %v2993_v38 = vpop.eup %1918  ;;  %1938 = vpow2.f32 %v1156_v34  ;;  %4846 = vst [vmem:[#allocation43_spill] sm:$0xff] %v3003_v23  ;;  %v572_v34 = vpop.xlane.xlu0 %571  ;;  %v629_v56 = vmul.f32 1.442695, %v2997_v52  ;;  %v3017_v27 = vsub.f32 %v2768_v51, %v1089_v41  ;;  %v631_v26 = vmul.f32 1.442695, %v3003_v23 }
 0x16e   : > { %v2999_v43 = vpop.eup %1920  ;;  %1940 = vpow2.f32 %v1158_v10  ;;  %4847 = vst [vmem:[#allocation44_spill] sm:$0xff] %v3009_v49  ;;  %4848 = vst [vmem:[#allocation45_spill] sm:$0xff] %v3013_v61  ;;  %v1196_v18 = vadd.f32 %v1911_v54, %v1909_v9  ;;  %v3028_v14 = vsub.f32 %v2804_v12, %v572_v34  ;;  %v3031_v51 = vsub.f32 %v2807_v16, %v572_v34 }
 0x16f   : > { %v3005_v53 = vpop.eup %1922  ;;  %1942 = vpow2.f32 %v1160_v25  ;;  %4849 = vst [vmem:[#allocation46_spill] sm:$0xff] %v3017_v27  ;;  %v3020_v25 = vsub.f32 %v2784_v58, %v1089_v41  ;;  %v3035_v24 = vsub.f32 %v2825_v37, %v572_v34  ;;  %v1174_v9 = vmul.f32 1.442695, %v3017_v27 }
 0x170   : > { %v1925_v33 = vpop.eup %1924  ;;  %1944 = vpow2.f32 %v1162_v40  ;;  %v3024_v40 = vsub.f32 %v2800_v7, %v1089_v41  ;;  %4852 = vst [vmem:[#allocation49_spill] sm:$0xff] %v3028_v14  ;;  %4853 = vst [vmem:[#allocation50_spill] sm:$0xff] %v3031_v51  ;;  %v1197_v7 = vadd.f32 %v1913_v19, %v1196_v18  ;;  %v3040_v12 = vsub.f32 %v2787_v59, %v1094_v47 }
 0x171   : > { %v1927_v10 = vpop.eup %1926  ;;  %1946 = vpow2.f32 %v1164_v0  ;;  %4850 = vst [vmem:[#allocation47_spill] sm:$0xff] %v3020_v25  ;;  %v633_v0 = vmul.f32 1.442695, %v3009_v49  ;;  %4854 = vst [vmem:[#allocation51_spill] sm:$0xff] %v3035_v24  ;;  %v1176_v54 = vmul.f32 1.442695, %v3020_v25  ;;  %v576_v37 = vpop.xlane.xlu0 %575  ;;  %v3049_v18 = vsub.f32 %v2812_v20, %v1094_v47 }
 0x172   : > { %v1929_v62 = vpop.eup %1928  ;;  %1948 = vpow2.f32 %v1166_v15  ;;  %4851 = vst [vmem:[#allocation48_spill] sm:$0xff] %v3024_v40  ;;  %v1172_v15 = vmul.f32 1.442695, %v3013_v61  ;;  %4855 = vst [vmem:[#allocation52_spill] sm:$0xff] %v3040_v12  ;;  %v1178_v16 = vmul.f32 1.442695, %v3024_v40  ;;  %v1198_v45 = vadd.f32 %v1915_v42, %v1197_v7  ;;  %v1099_v25 = vpop.xlane.xlu1 %1098 }
 0x173   : > { %v1931_v2 = vpop.eup %1930  ;;  %1950 = vpow2.f32 %v1168_v28  ;;  %v635_v19 = vmul.f32 1.442695, %v3028_v14  ;;  %4857 = vst [vmem:[#allocation54_spill] sm:$0xff] %v3049_v18  ;;  %v3053_v40 = vsub.f32 %v2828_v39, %v1094_v47  ;;  %v3057_v7 = vsub.f32 %v2834_v46, %v576_v37 }
 0x174   : > { %v1933_v58 = vpop.eup %1932  ;;  %1952 = vpow2.f32 %v1170_v55  ;;  %v3044_v55 = vsub.f32 %v2790_v60, %v1094_v47  ;;  %1199 = vadd.xlane.f32.xlu0 %v1198_v45  ;;  %v1206_v60 = vadd.f32 %v1927_v10, %v1925_v33  ;;  %v1184_v45 = vmul.f32 1.442695, %v3049_v18 }
 0x175   : > { %v1935_v41 = vpop.eup %1934  ;;  %1954 = vpow2.f32 %v629_v56  ;;  %v637_v56 = vmul.f32 1.442695, %v3031_v51  ;;  %4858 = vst [vmem:[#allocation55_spill] sm:$0xff] %v3053_v40  ;;  %4859 = vst [vmem:[#allocation56_spill] sm:$0xff] %v3057_v7  ;;  %v1186_v46 = vmul.f32 1.442695, %v3053_v40 }
 0x176   : > { %v1937_v28 = vpop.eup %1936  ;;  %1956 = vpow2.f32 %v631_v26  ;;  %4856 = vst [vmem:[#allocation53_spill] sm:$0xff] %v3044_v55  ;;  %v639_v26 = vmul.f32 1.442695, %v3035_v24  ;;  %v665_v51 = vadd.f32 %v1935_v41, %v1933_v58  ;;  %v3061_v24 = vsub.f32 %v2837_v48, %v576_v37 }
 0x177   : > { %v1939_v34 = vpop.eup %1938  ;;  %1958 = vpow2.f32 %v633_v0  ;;  %v1180_v0 = vmul.f32 1.442695, %v3040_v12  ;;  %v1207_v39 = vadd.f32 %v1929_v62, %v1206_v60  ;;  %v3066_v58 = vsub.f32 %v2845_v57, %v576_v37 }
 0x178   : > { %v1941_v59 = vpop.eup %1940  ;;  %1960 = vpow2.f32 %v1172_v15  ;;  %v1182_v15 = vmul.f32 1.442695, %v3044_v55  ;;  %4860 = vst [vmem:[#allocation57_spill] sm:$0xff] %v3061_v24  ;;  %v666_v33 = vadd.f32 %v1937_v28, %v665_v51  ;;  %v641_v48 = vmul.f32 1.442695, %v3057_v7 }
 0x179   : > { %v1943_v42 = vpop.eup %1942  ;;  %1962 = vpow2.f32 %v1174_v9  ;;  %v1211_v10 = vadd.f32 %v1941_v59, %v1939_v34  ;;  %4861 = vst [vmem:[#allocation58_spill] sm:$0xff] %v3066_v58  ;;  %v1208_v41 = vadd.f32 %v1931_v2, %v1207_v39  ;;  %v643_v51 = vmul.f32 1.442695, %v3061_v24  ;;  %v4863_v2 = vld [vmem:[#allocation15_spill] sm:$0xff] }
 0x17a   : > { %v1945_v20 = vpop.eup %1944  ;;  %1964 = vpow2.f32 %v1176_v54  ;;  %667 = vadd.xlane.f32.xlu1 %v666_v33  ;;  %v3073_v28 = vsub.f32 %v2815_v22, %v1099_v25  ;;  %v3076_v34 = vsub.f32 %v4863_v2, %v1099_v25 }
 0x17b   : > { %v1947_v47 = vpop.eup %1946  ;;  %1966 = vpow2.f32 %v1178_v16  ;;  %v1212_v62 = vadd.f32 %v1943_v42, %v1211_v10  ;;  %v1201_v16 = vadd.f32 %v2993_v38, %v2987_v1  ;;  %1209 = vadd.xlane.f32.xlu0 %v1208_v41  ;;  %v645_v1 = vmul.f32 1.442695, %v3066_v58  ;;  %v4865_v38 = vld [vmem:[#allocation16_spill] sm:$0xff] }
 0x17c   : > { %v1949_v9 = vpop.eup %1948  ;;  %1968 = vpow2.f32 %v635_v19  ;;  %4862 = vst [vmem:[#allocation59_spill] sm:$0xff] %v3073_v28  ;;  %4864 = vst [vmem:[#allocation15_spill] sm:$0xff] %v3076_v34  ;;  %v580_v19 = vpop.xlane.xlu1 %579  ;;  %v1190_v41 = vmul.f32 1.442695, %v3076_v34  ;;  %v3255_v34 = vld [vmem:[%s2637_s13 + $0x58] sm:$0xff] }
 0x17d   : > { %v1951_v54 = vpop.eup %1950  ;;  %1970 = vpow2.f32 %v637_v56  ;;  %v1216_v57 = vadd.f32 %v1949_v9, %v1947_v47  ;;  %v1213_v56 = vadd.f32 %v1945_v20, %v1212_v62  ;;  %v1202_v59 = vadd.f32 %v2999_v43, %v1201_v16  ;;  %4884 = vst [vmem:[#allocation77_spill] sm:$0xff] %v3255_v34 }
 0x17e   : > { %v1953_v60 = vpop.eup %1952  ;;  %1972 = vpow2.f32 %v639_v26  ;;  %v3081_v26 = vsub.f32 %v4865_v38, %v1099_v25  ;;  %v3084_v47 = vsub.f32 %v2851_v3, %v1099_v25  ;;  %v1188_v43 = vmul.f32 1.442695, %v3073_v28 }
 0x17f   : > { %v1955_v37 = vpop.eup %1954  ;;  %1974 = vpow2.f32 %v1180_v0  ;;  %v1217_v22 = vadd.f32 %v1951_v54, %v1216_v57  ;;  %v1203_v0 = vadd.f32 %v3005_v53, %v1202_v59  ;;  %v3089_v20 = vsub.f32 %v2854_v11, %v580_v19  ;;  %1214 = vadd.xlane.f32.xlu0 %v1213_v56 }
 0x180   : > { %v1957_v42 = vpop.eup %1956  ;;  %1976 = vpow2.f32 %v1182_v15  ;;  %4866 = vst [vmem:[#allocation16_spill] sm:$0xff] %v3081_v26  ;;  %4867 = vst [vmem:[#allocation60_spill] sm:$0xff] %v3084_v47  ;;  %v1192_v25 = vmul.f32 1.442695, %v3081_v26  ;;  %v1194_v62 = vmul.f32 1.442695, %v3084_v47 }
 0x181   : > { %v1959_v39 = vpop.eup %1958  ;;  %1978 = vpow2.f32 %v1184_v45  ;;  %v669_v33 = vadd.f32 %v1957_v42, %v1955_v37  ;;  %4868 = vst [vmem:[#allocation61_spill] sm:$0xff] %v3089_v20  ;;  %v1218_v15 = vadd.f32 %v1953_v60, %v1217_v22  ;;  %v3093_v45 = vsub.f32 %v2857_v17, %v580_v19  ;;  %1204 = vadd.xlane.f32.xlu1 %v1203_v0 }
 0x182   : > { %v1961_v10 = vpop.eup %1960  ;;  %1980 = vpow2.f32 %v1186_v46  ;;  %v3097_v46 = vsub.f32 %v2864_v44, %v580_v19  ;;  %v647_v16 = vmul.f32 1.442695, %v3089_v20 }
 0x183   : > { %v1963_v9 = vpop.eup %1962  ;;  %1982 = vpow2.f32 %v641_v48  ;;  %4869 = vst [vmem:[#allocation62_spill] sm:$0xff] %v3093_v45  ;;  %v670_v3 = vadd.f32 %v1959_v39, %v669_v33  ;;  %1219 = vadd.xlane.f32.xlu0 %v1218_v15 }
 0x184   : > { %v1965_v53 = vpop.eup %1964  ;;  %1984 = vpow2.f32 %v643_v51  ;;  %4870 = vst [vmem:[#allocation63_spill] sm:$0xff] %v3097_v46  ;;  %v1221_v11 = vadd.f32 %v1963_v9, %v1961_v10  ;;  %v649_v51 = vmul.f32 1.442695, %v3093_v45  ;;  %v651_v44 = vmul.f32 1.442695, %v3097_v46 }
 0x185   : > { %v1967_v54 = vpop.eup %1966  ;;  %1986 = vpow2.f32 %v645_v1  ;;  %671 = vadd.xlane.f32.xlu1 %v670_v3 }
 0x186   : > { %v1969_v48 = vpop.eup %1968  ;;  %1988 = vpow2.f32 %v1188_v43  ;;  %v1222_v17 = vadd.f32 %v1965_v53, %v1221_v11 }
 0x187   : > { %v1971_v60 = vpop.eup %1970  ;;  %1990 = vpow2.f32 %v1190_v41 }
 0x188   : > { %v1973_v57 = vpop.eup %1972  ;;  %1992 = vpow2.f32 %v1192_v25  ;;  %v1223_v37 = vadd.f32 %v1967_v54, %v1222_v17  ;;  %v673_v2 = vadd.f32 %v1971_v60, %v1969_v48 }
 0x189   : > { %v1975_v19 = vpop.eup %1974  ;;  %1994 = vpow2.f32 %v1194_v62 }
 0x18a   : > { %v1977_v56 = vpop.eup %1976  ;;  %1996 = vpow2.f32 %v647_v16  ;;  %1224 = vadd.xlane.f32.xlu0 %v1223_v37  ;;  %v674_v59 = vadd.f32 %v1973_v57, %v673_v2  ;;  %v3107_v57 = vld [vmem:[%s2627_s9 + $0x8] sm:$0xff]  ;;  %v3114_v37 = vld [vmem:[%s2627_s9 + $0x18] sm:$0xff]  ;;  %v3118_v2 = vld [vmem:[%s2627_s9 + $0x20] sm:$0xff] }
 0x18b   : > { %v1979_v42 = vpop.eup %1978  ;;  %1998 = vpow2.f32 %v649_v51  ;;  %v1226_v1 = vadd.f32 %v1977_v56, %v1975_v19  ;;  %v3104_v51 = vld [vmem:[%s2627_s9] sm:$0xff]  ;;  %vm726_vm1 = vcmp.gt.f32.partialorder %v3107_v57, 0.0  ;;  %v3122_v19 = vld [vmem:[%s2627_s9 + $0x28] sm:$0xff]  ;;  %vm728_vm3 = vcmp.gt.f32.partialorder %v3114_v37, 0.0 }
 0x18c   : > { %v1981_v38 = vpop.eup %1980  ;;  %2000 = vpow2.f32 %v651_v44  ;;  %675 = vadd.xlane.f32.xlu1 %v674_v59  ;;  %v3110_v44 = vld [vmem:[%s2627_s9 + $0x10] sm:$0xff]  ;;  %vm725_vm0 = vcmp.gt.f32.partialorder %v3104_v51, 0.0  ;;  %vm729_vm4 = vcmp.gt.f32.partialorder %v3118_v2, 0.0  ;;  %vm730_vm5 = vcmp.gt.f32.partialorder %v3122_v19, 0.0 }
 0x18d   : > { %v1983_v22 = vpop.eup %1982  ;;  %v1227_v39 = vadd.f32 %v1979_v42, %v1226_v1  ;;  %vm727_vm2 = vcmp.gt.f32.partialorder %v3110_v44, 0.0  ;;  %v749_v56 = vsel %vm725_vm0, %v3104_v51, 1.0  ;;  %v3129_v59 = vld [vmem:[%s2627_s9 + $0x30] sm:$0xff]  ;;  %v750_v42 = vsel %vm726_vm1, %v3107_v57, 1.0  ;;  %v3136_v1 = vld [vmem:[%s2627_s9 + $0x38] sm:$0xff] }
 0x18e   : > { %v1985_v0 = vpop.eup %1984  ;;  %2002 = vlog2.f32 %v749_v56  ;;  %vm731_vm6 = vcmp.gt.f32.partialorder %v3129_v59, 0.0  ;;  %vm732_vm7 = vcmp.gt.f32.partialorder %v3136_v1, 0.0 }
 0x18f   : > { %v1987_v33 = vpop.eup %1986  ;;  %v1228_v10 = vadd.f32 %v1981_v38, %v1227_v39  ;;  %v677_v43 = vadd.f32 %v1985_v0, %v1983_v22  ;;  %v751_v38 = vsel %vm727_vm2, %v3110_v44, 1.0  ;;  %v3143_v22 = vld [vmem:[%s2627_s9 + $0x40] sm:$0xff]  ;;  %v459_v39 = vlaneseq }
 0x190   : > { %v1989_v15 = vpop.eup %1988  ;;  %v752_v0 = vsel %vm728_vm3, %v3114_v37, 1.0  ;;  %2004 = vlog2.f32 %v750_v42  ;;  %vm733_vm8 = vcmp.gt.f32.partialorder %v3143_v22, 0.0 }
 0x191   : > { %v1991_v9 = vpop.eup %1990  ;;  %1229 = vadd.xlane.f32.xlu0 %v1228_v10  ;;  %v678_v41 = vadd.f32 %v1987_v33, %v677_v43  ;;  %v3150_v33 = vld [vmem:[%s2627_s9 + $0x48] sm:$0xff]  ;;  %v753_v10 = vsel %vm729_vm4, %v3118_v2, 1.0  ;;  %v3157_v43 = vld [vmem:[%s2627_s9 + $0x50] sm:$0xff]  ;;  %2006 = vlog2.f32 %v751_v38 }
 0x192   : > { %v1993_v3 = vpop.eup %1992  ;;  %v1231_v53 = vadd.f32 %v1991_v9, %v1989_v15  ;;  %4871 = vst [vmem:[#allocation64_spill] sm:$0xff] %v3150_v33  ;;  %4872 = vst [vmem:[#allocation65_spill] sm:$0xff] %v3157_v43  ;;  %v754_v15 = vsel %vm730_vm5, %v3122_v19, 1.0  ;;  %v3164_v9 = vld [vmem:[%s2627_s9 + $0x58] sm:$0xff]  ;;  %2008 = vlog2.f32 %v752_v0  ;;  %vm4777_vm9 = vcmp.gt.f32.partialorder %v3150_v33, 0.0  ;;  %v3210_v38 = vld [vmem:[%s2627_s9 + $0x68] sm:$0xff] }
 0x193   : > { %v1995_v25 = vpop.eup %1994  ;;  %679 = vadd.xlane.f32.xlu1 %v678_v41  ;;  %4873 = vst [vmem:[#allocation66_spill] sm:$0xff] %v3164_v9  ;;  %v755_v41 = vsel %vm731_vm6, %v3129_v59, 1.0  ;;  %2010 = vlog2.f32 %v753_v10  ;;  %vm4637_vm10 = vcmp.gt.f32.partialorder %v3157_v43, 0.0  ;;  %vm4633_vm11 = vcmp.gt.f32.partialorder %v3164_v9, 0.0  ;;  %4879 = vst [vmem:[#allocation72_spill] sm:$0xff] %v3210_v38 }
 0x194   : > { %v1997_v11 = vpop.eup %1996  ;;  %v1232_v54 = vadd.f32 %v1993_v3, %v1231_v53  ;;  %v3171_v3 = vld [vmem:[%s2637_s13 + $0x20] sm:$0xff]  ;;  %v3173_v53 = vshrl.u32 %v459_v39, 7  ;;  %2012 = vlog2.f32 %v754_v15  ;;  %v760_v42 = vsel %vm4633_vm11, %v3164_v9, 1.0  ;;  %v3222_v15 = vld [vmem:[%s2627_s9 + $0x70] sm:$0xff] }
 0x195   : > { %v1999_v62 = vpop.eup %1998  ;;  %4874 = vst [vmem:[#allocation67_spill] sm:$0xff] %v3171_v3  ;;  %2014 = vlog2.f32 %v755_v41  ;;  %vm4636_vm12 = vcmp.gt.f32.partialorder %v3171_v3, 0.0  ;;  %v3213_v39 = vld [vmem:[%s2637_s13 + $0x40] sm:$0xff]  ;;  %v3215_v0 = vstv %s1821_s29  ;;  %4881 = vst [vmem:[#allocation74_spill] sm:$0xff] %v3222_v15  ;;  %s2347_s29 = smov [#allocation10]  }
 0x196   : > { %v2001_v48 = vpop.eup %2000  ;;  %v1233_v16 = vadd.f32 %v1995_v25, %v1232_v54  ;;  %v681_v17 = vadd.f32 %v1999_v62, %v1997_v11  ;;  %v756_v25 = vsel %vm732_vm7, %v3136_v1, 1.0  ;;  %v3180_v11 = vld [vmem:[%s2637_s13 + $0x28] sm:$0xff]  ;;  %v757_v54 = vsel %vm733_vm8, %v3143_v22, 1.0  ;;  %v3187_v62 = vld [vmem:[%s2637_s13 + $0x30] sm:$0xff]  ;;  %4880 = vst [vmem:[#allocation73_spill] sm:$0xff] %v3213_v39  ;;  %s2262_s22 = sshll.u32 %s2347_s29, 4  ;;  %s2263_s22 = int_to_ptr.vmem [resolvable:$false] %s2262_s22 }
 0x197   : > { %4875 = vst [vmem:[#allocation68_spill] sm:$0xff] %v3180_v11  ;;  %4876 = vst [vmem:[#allocation69_spill] sm:$0xff] %v3187_v62  ;;  %2016 = vlog2.f32 %v756_v25  ;;  %vm4640_vm13 = vcmp.gt.f32.partialorder %v3180_v11, 0.0  ;;  %v461_v56 = vadd.s32 8, %v3173_v53  ;;  %vm4649_vm14 = vcmp.gt.f32.partialorder %v3187_v62, 0.0  ;;  %s2264_s28 = scalar_lea.vmem %s2263_s22, 256  ;;  %p2265_p13 = scmp.lt.s32.totalorder %s4554_s15, %s2263_s22 }
 0x198   : > { %1234 = vadd.xlane.f32.xlu0 %v1233_v16  ;;  %v682_v60 = vadd.f32 %v2001_v48, %v681_v17  ;;  %v758_v48 = vsel %vm4777_vm9, %v3150_v33, 1.0  ;;  %v3194_v16 = vld [vmem:[%s2637_s13 + $0x38] sm:$0xff]  ;;  %v759_v17 = vsel %vm4637_vm10, %v3157_v43, 1.0  ;;  %2018 = vlog2.f32 %v757_v54  ;;  %v2003_v41 = vpop.eup %2002 }
 0x199   : > { %4877 = vst [vmem:[#allocation70_spill] sm:$0xff] %v3194_v16  ;;  %2020 = vlog2.f32 %v758_v48  ;;  %vm4671_vm15 = vcmp.gt.f32.partialorder %v3194_v16, 0.0  ;;  %v1320_v10 = vsel %vm4636_vm12, %v3171_v3, 1.0  ;;  %v462_v25 = vadd.s32 16, %v3173_v53  ;;  %v3230_v48 = vld [vmem:[%s2637_s13 + $0x48] sm:$0xff] }
 0x19a   : > { %683 = vadd.xlane.f32.xlu1 %v682_v60  ;;  %v3202_v60 = vld [vmem:[%s2627_s9 + $0x60] sm:$0xff]  ;;  %2022 = vlog2.f32 %v759_v17  ;;  %v1321_v54 = vsel %vm4640_vm13, %v3180_v11, 1.0  ;;  %4882 = vst [vmem:[#allocation75_spill] sm:$0xff] %v3230_v48  ;;  %v2005_v47 = vpop.eup %2004  ;;  %v1322_v26 = vsel %vm4649_vm14, %v3187_v62, 1.0  ;;  %vm4661_vm12 = vcmp.gt.f32.partialorder %v3210_v38, 0.0  ;;  %v3321_v62 = vld [vmem:[%s2637_s13 + $0x70] sm:$0xff] }
 0x19b   : > { %4878 = vst [vmem:[#allocation71_spill] sm:$0xff] %v3202_v60  ;;  %vm4658_vm11 = vcmp.gt.f32.partialorder %v3202_v60, 0.0  ;;  %2024 = vlog2.f32 %v760_v42  ;;  %vm4771_vm10 = vcmp.gt.f32.partialorder %v3213_v39, 0.0  ;;  %v2007_v17 = vpop.eup %2006  ;;  %v3239_v40 = vadd.s32 %v3215_v0, %v3173_v53  ;;  %v3246_v42 = vld [vmem:[%s2637_s13 + $0x50] sm:$0xff]  ;;  %4889 = vst [vmem:[#allocation82_spill] sm:$0xff] %v3321_v62 }
 0x19c   : > { %v1323_v18 = vsel %vm4671_vm15, %v3194_v16, 1.0  ;;  %2026 = vlog2.f32 %v1320_v10  ;;  %vm4668_vm13 = vcmp.gt.f32.partialorder %v3222_v15, 0.0  ;;  %4883 = vst [vmem:[#allocation76_spill] sm:$0xff] %v3246_v42  ;;  %v2009_v46 = vpop.eup %2008  ;;  %v3249_v45 = vadd.s32 %v3215_v0, %v461_v56 }
 0x19d   : > { %2028 = vlog2.f32 %v1321_v54  ;;  %v761_v20 = vsel %vm4658_vm11, %v3202_v60, 1.0  ;;  %vm4678_vm14 = vcmp.gt.f32.partialorder %v3230_v48, 0.0  ;;  %v2011_v28 = vpop.eup %2010  ;;  %v3258_v10 = vmul.f32 0.6931472, %v2003_v41  ;;  %v3267_v54 = vld [vmem:[%s2637_s13] sm:$0xff] }
 0x19e   : > { %v3261_v58 = vadd.s32 %v3215_v0, %v462_v25  ;;  %2030 = vlog2.f32 %v1322_v26  ;;  %v762_v56 = vsel %vm4661_vm12, %v3210_v38, 1.0  ;;  %v2013_v24 = vpop.eup %2012  ;;  %v3269_v7 = vmul.f32 0.6931472, %v2005_v47  ;;  %v3276_v25 = vld [vmem:[%s2637_s13 + $0x8] sm:$0xff] }
 0x19f   : > { %2032 = vlog2.f32 %v1323_v18  ;;  %v763_v41 = vsel %vm4668_vm13, %v3222_v15, 1.0  ;;  %vm4681_vm11 = vcmp.gt.f32.partialorder %v3246_v42, 0.0  ;;  %v2015_v26 = vpop.eup %2014  ;;  %v3278_v55 = vmul.f32 0.6931472, %v2007_v17  ;;  %v3285_v18 = vld [vmem:[%s2637_s13 + $0x10] sm:$0xff]  ;;  %v3293_v15 = vld [vmem:[%s2637_s13 + $0x18] sm:$0xff] }
 0x1a0   : > { %2034 = vlog2.f32 %v761_v20  ;;  %vm4688_vm12 = vcmp.gt.f32.partialorder %v3255_v34, 0.0  ;;  %v1324_v47 = vsel %vm4771_vm10, %v3213_v39, 1.0  ;;  %4885 = vst [vmem:[#allocation78_spill] sm:$0xff] %v3285_v18  ;;  %v3287_v38 = vmul.f32 0.6931472, %v2009_v46  ;;  %4886 = vst [vmem:[#allocation79_spill] sm:$0xff] %v3293_v15 }
 0x1a1   : > { %v2017_v12 = vpop.eup %2016  ;;  %2036 = vlog2.f32 %v762_v56  ;;  %v1325_v17 = vsel %vm4678_vm14, %v3230_v48, 1.0  ;;  %vm4691_vm13 = vcmp.gt.f32.partialorder %v3267_v54, 0.0  ;;  %v3296_v14 = vmul.f32 0.6931472, %v2011_v28  ;;  %v3303_v56 = vld [vmem:[%s2637_s13 + $0x60] sm:$0xff]  ;;  %v3312_v28 = vld [vmem:[%s2637_s13 + $0x68] sm:$0xff] }
 0x1a2   : > { %v2019_v20 = vpop.eup %2018  ;;  %2038 = vlog2.f32 %v763_v41  ;;  %v1326_v46 = vsel %vm4681_vm11, %v3246_v42, 1.0  ;;  %vm4695_vm15 = vcmp.gt.f32.partialorder %v3276_v25, 0.0  ;;  %4887 = vst [vmem:[#allocation80_spill] sm:$0xff] %v3303_v56  ;;  %v3305_v16 = vmul.f32 0.6931472, %v2013_v24  ;;  %4888 = vst [vmem:[#allocation81_spill] sm:$0xff] %v3312_v28 }
 0x1a3   : > { %v2021_v60 = vpop.eup %2020  ;;  %v1327_v27 = vsel %vm4688_vm12, %v3255_v34, 1.0  ;;  %2040 = vlog2.f32 %v1324_v47  ;;  %vm4698_vm14 = vcmp.gt.f32.partialorder %v3285_v18, 0.0  ;;  %v3314_v61 = vmul.f32 0.6931472, %v2015_v26  ;;  %v3329_v47 = vld [vmem:[%s2637_s13 + $0x78] sm:$0xff] }
 0x1a4   : > { %v2023_v41 = vpop.eup %2022  ;;  %2042 = vlog2.f32 %v1325_v17  ;;  %vm4707_vm11 = vcmp.gt.f32.partialorder %v3293_v15, 0.0  ;;  %v1316_v24 = vsel %vm4691_vm13, %v3267_v54, 1.0  ;;  %v3323_v34 = vmul.f32 0.6931472, %v2017_v12  ;;  %4890 = vst [vmem:[#allocation83_spill] sm:$0xff] %v3329_v47 }
 0x1a5   : > { %v2025_v11 = vpop.eup %2024  ;;  %2044 = vlog2.f32 %v1326_v46  ;;  %v1317_v26 = vsel %vm4695_vm15, %v3276_v25, 1.0  ;;  %vm4710_vm12 = vcmp.gt.f32.partialorder %v3303_v56, 0.0  ;;  %v3332_v42 = vmul.f32 0.6931472, %v2019_v20  ;;  %v3339_v46 = vld [vmem:[%s2627_s9 + $0x78] sm:$0xff] }
 0x1a6   : > { %v2027_v17 = vpop.eup %2026  ;;  %2046 = vlog2.f32 %v1327_v27  ;;  %v1318_v12 = vsel %vm4698_vm14, %v3285_v18, 1.0  ;;  %vm4717_vm13 = vcmp.gt.f32.partialorder %v3312_v28, 0.0  ;;  %4891 = vst [vmem:[#allocation84_spill] sm:$0xff] %v3339_v46  ;;  %v3342_v49 = vadd.s32 24, %v3173_v53  ;;  %v3349_v27 = vld [vmem:[%s2627_s9 + $0x80] sm:$0xff] }
 0x1a7   : > { %v2029_v3 = vpop.eup %2028  ;;  %v1319_v20 = vsel %vm4707_vm11, %v3293_v15, 1.0  ;;  %2048 = vlog2.f32 %v1316_v24  ;;  %vm4720_vm15 = vcmp.gt.f32.partialorder %v3321_v62, 0.0  ;;  %4892 = vst [vmem:[#allocation85_spill] sm:$0xff] %v3349_v27  ;;  %v3351_v52 = vmul.f32 0.6931472, %v2021_v60  ;;  %v3367_v24 = vld [vmem:[%s2637_s13 + $0x80] sm:$0xff] }
 0x1a8   : > { %v2031_v23 = vpop.eup %2030  ;;  %2050 = vlog2.f32 %v1317_v26  ;;  %vm4725_vm14 = vcmp.gt.f32.partialorder %v3329_v47, 0.0  ;;  %v1328_v48 = vsel %vm4710_vm12, %v3303_v56, 1.0  ;;  %v3360_v15 = vmul.f32 0.6931472, %v2023_v41  ;;  %4896 = vst [vmem:[#allocation89_spill] sm:$0xff] %v3367_v24 }
 0x1a9   : > { %4893 = vst [vmem:[#allocation86_spill] sm:$0xff] %v3351_v52  ;;  %v2033_v35 = vpop.eup %2032  ;;  %2052 = vlog2.f32 %v1318_v12  ;;  %v1329_v60 = vsel %vm4717_vm13, %v3312_v28, 1.0  ;;  %vm4730_vm11 = vcmp.gt.f32.partialorder %v3339_v46, 0.0  ;;  %v3369_v39 = vmul.f32 0.6931472, %v2025_v11  ;;  %v3376_v12 = vld [vmem:[%s2637_s13 + $0x88] sm:$0xff] }
 0x1aa   : > { %4895 = vst [vmem:[#allocation88_spill] sm:$0xff] %v3360_v15  ;;  %v2035_v26 = vpop.eup %2034  ;;  %2054 = vlog2.f32 %v1319_v20  ;;  %v1330_v41 = vsel %vm4720_vm15, %v3321_v62, 1.0  ;;  %vm4733_vm12 = vcmp.gt.f32.partialorder %v3349_v27, 0.0  ;;  %4898 = vst [vmem:[#allocation91_spill] sm:$0xff] %v3376_v12  ;;  %v3378_v21 = vmul.f32 0.6931472, %v2027_v17 }
 0x1ab   : > { %4897 = vst [vmem:[#allocation90_spill] sm:$0xff] %v3369_v39  ;;  %v2037_v56 = vpop.eup %2036  ;;  %v1331_v28 = vsel %vm4725_vm14, %v3329_v47, 1.0  ;;  %2056 = vlog2.f32 %v1328_v48  ;;  %vm4736_vm13 = vcmp.gt.f32.partialorder %v3358_v50, 0.0  ;;  %v3385_v11 = vld [vmem:[%s2637_s13 + $0x90] sm:$0xff]  ;;  %v3388_v62 = vadd.s32 32, %v3173_v53  ;;  %v3527_v52 = vld [vmem:[%s2637_s13 + $0xd8] sm:$0xff] }
 0x1ac   : > { %4899 = vst [vmem:[#allocation92_spill] sm:$0xff] %v3378_v21  ;;  %4900 = vst [vmem:[#allocation93_spill] sm:$0xff] %v3385_v11  ;;  %v2039_v20 = vpop.eup %2038  ;;  %2058 = vlog2.f32 %v1329_v60  ;;  %v764_v17 = vsel %vm4730_vm11, %v3339_v46, 1.0  ;;  %v3394_v21 = vld [vmem:[%s2637_s13 + $0x98] sm:$0xff]  ;;  %vm4741_vm15 = vcmp.gt.f32.partialorder %v3367_v24, 0.0  ;;  %v765_v31 = vsel %vm4733_vm12, %v3349_v27, 1.0 }
 0x1ad   : > { %4901 = vst [vmem:[#allocation94_spill] sm:$0xff] %v3394_v21  ;;  %v2041_v47 = vpop.eup %2040  ;;  %v3397_v48 = vmul.f32 0.6931472, %v2029_v3  ;;  %2060 = vlog2.f32 %v1330_v41  ;;  %vm4744_vm14 = vcmp.gt.f32.partialorder %v3376_v12, 0.0  ;;  %v3404_v60 = vld [vmem:[%s2627_s9 + $0x90] sm:$0xff]  ;;  %v766_v3 = vsel %vm4736_vm13, %v3358_v50, 1.0 }
 0x1ae   : > { %4903 = vst [vmem:[#allocation96_spill] sm:$0xff] %v3404_v60  ;;  %v2043_v9 = vpop.eup %2042  ;;  %v3406_v43 = vmul.f32 0.6931472, %v2031_v23  ;;  %2062 = vlog2.f32 %v1331_v28  ;;  %vm4747_vm11 = vcmp.gt.f32.partialorder %v3385_v11, 0.0  ;;  %v3413_v41 = vld [vmem:[%s2627_s9 + $0x98] sm:$0xff]  ;;  %vm4750_vm12 = vcmp.gt.f32.partialorder %v3394_v21, 0.0 }
 0x1af   : > { %4902 = vst [vmem:[#allocation95_spill] sm:$0xff] %v3397_v48  ;;  %4905 = vst [vmem:[#allocation98_spill] sm:$0xff] %v3413_v41  ;;  %v2045_v46 = vpop.eup %2044  ;;  %v3415_v48 = vmul.f32 0.6931472, %v2033_v35  ;;  %2064 = vlog2.f32 %v764_v17  ;;  %v1332_v23 = vsel %vm4741_vm15, %v3367_v24, 1.0  ;;  %v3422_v28 = vld [vmem:[%s2627_s9 + $0xa0] sm:$0xff] }
 0x1b0   : > { %4904 = vst [vmem:[#allocation97_spill] sm:$0xff] %v3406_v43  ;;  %4907 = vst [vmem:[#allocation100_spill] sm:$0xff] %v3422_v28  ;;  %v2047_v27 = vpop.eup %2046  ;;  %v3424_v43 = vmul.f32 0.6931472, %v2035_v26  ;;  %2066 = vlog2.f32 %v765_v31  ;;  %v1333_v35 = vsel %vm4744_vm14, %v3376_v12, 1.0  ;;  %vm4753_vm13 = vcmp.gt.f32.partialorder %v3404_v60, 0.0 }
 0x1b1   : > { %4906 = vst [vmem:[#allocation99_spill] sm:$0xff] %v3415_v48  ;;  %v3431_v17 = vld [vmem:[%s2637_s13 + $0xa0] sm:$0xff]  ;;  %v2049_v50 = vpop.eup %2048  ;;  %v3433_v48 = vmul.f32 0.6931472, %v2037_v56  ;;  %2068 = vlog2.f32 %v766_v3  ;;  %v1334_v24 = vsel %vm4747_vm11, %v3385_v11, 1.0  ;;  %vm4769_vm15 = vcmp.gt.f32.partialorder %v3413_v41, 0.0 }
 0x1b2   : > { %4908 = vst [vmem:[#allocation101_spill] sm:$0xff] %v3424_v43  ;;  %4909 = vst [vmem:[#allocation102_spill] sm:$0xff] %v3431_v17  ;;  %v3440_v26 = vld [vmem:[%s2637_s13 + $0xa8] sm:$0xff]  ;;  %v2051_v31 = vpop.eup %2050  ;;  %v3442_v43 = vmul.f32 0.6931472, %v2039_v20  ;;  %v1335_v12 = vsel %vm4750_vm12, %v3394_v21, 1.0  ;;  %2070 = vlog2.f32 %v1332_v23 }
 0x1b3   : > { %4910 = vst [vmem:[#allocation103_spill] sm:$0xff] %v3433_v48  ;;  %4911 = vst [vmem:[#allocation104_spill] sm:$0xff] %v3440_v26  ;;  %vm4756_vm14 = vcmp.gt.f32.partialorder %v3422_v28, 0.0  ;;  %v3449_v56 = vld [vmem:[%s2637_s13 + $0xb0] sm:$0xff]  ;;  %v2053_v3 = vpop.eup %2052  ;;  %v3451_v48 = vmul.f32 0.6931472, %v2041_v47  ;;  %2072 = vlog2.f32 %v1333_v35 }
 0x1b4   : > { %4912 = vst [vmem:[#allocation105_spill] sm:$0xff] %v3442_v43  ;;  %4913 = vst [vmem:[#allocation106_spill] sm:$0xff] %v3449_v56  ;;  %v767_v11 = vsel %vm4753_vm13, %v3404_v60, 1.0  ;;  %vm4768_vm11 = vcmp.gt.f32.partialorder %v3431_v17, 0.0  ;;  %v2055_v20 = vpop.eup %2054  ;;  %v3457_v43 = vmul.f32 0.6931472, %v2043_v9  ;;  %2074 = vlog2.f32 %v1334_v24 }
 0x1b5   : > { %4914 = vst [vmem:[#allocation107_spill] sm:$0xff] %v3451_v48  ;;  %v768_v23 = vsel %vm4769_vm15, %v3413_v41, 1.0  ;;  %v3463_v21 = vld [vmem:[%s2637_s13 + $0xb8] sm:$0xff]  ;;  %vm4763_vm12 = vcmp.gt.f32.partialorder %v3440_v26, 0.0  ;;  %v2057_v47 = vpop.eup %2056  ;;  %v3466_v35 = vmul.f32 0.6931472, %v2045_v46  ;;  %2076 = vlog2.f32 %v1335_v12 }
 0x1b6   : > { %4915 = vst [vmem:[#allocation108_spill] sm:$0xff] %v3457_v43  ;;  %4916 = vst [vmem:[#allocation109_spill] sm:$0xff] %v3463_v21  ;;  %v769_v60 = vsel %vm4756_vm14, %v3422_v28, 1.0  ;;  %vm4766_vm13 = vcmp.gt.f32.partialorder %v3449_v56, 0.0  ;;  %v2059_v9 = vpop.eup %2058  ;;  %v3472_v24 = vmul.f32 0.6931472, %v2047_v27  ;;  %2078 = vlog2.f32 %v767_v11 }
 0x1b7   : > { %4917 = vst [vmem:[#allocation110_spill] sm:$0xff] %v3466_v35  ;;  %v3474_v41 = vmul.f32 0.6931472, %v2049_v50  ;;  %v1336_v46 = vsel %vm4768_vm11, %v3431_v17, 1.0  ;;  %v3480_v35 = vld [vmem:[%s2627_s9 + $0xa8] sm:$0xff]  ;;  %v2061_v12 = vpop.eup %2060  ;;  %2080 = vlog2.f32 %v768_v23  ;;  %vm4770_vm14 = vcmp.gt.f32.partialorder %v3463_v21, 0.0 }
 0x1b8   : > { %4918 = vst [vmem:[#allocation111_spill] sm:$0xff] %v3472_v24  ;;  %4919 = vst [vmem:[#allocation112_spill] sm:$0xff] %v3480_v35  ;;  %v3482_v43 = vmul.f32 0.6931472, %v2051_v31  ;;  %v1337_v50 = vsel %vm4763_vm12, %v3440_v26, 1.0  ;;  %v3489_v27 = vld [vmem:[%s2627_s9 + $0xb0] sm:$0xff]  ;;  %v2063_v11 = vpop.eup %2062  ;;  %v3493_v17 = vadd.s32 %v3215_v0, %v3342_v49  ;;  %2082 = vlog2.f32 %v769_v60 }
 0x1b9   : > { %4920 = vst [vmem:[#allocation113_spill] sm:$0xff] %v3489_v27  ;;  %v3495_v28 = vmul.f32 0.6931472, %v2053_v3  ;;  %v1338_v31 = vsel %vm4766_vm13, %v3449_v56, 1.0  ;;  %v3501_v23 = vld [vmem:[%s2637_s13 + $0xc0] sm:$0xff]  ;;  %v3504_v24 = vld [vmem:[%s2637_s13 + $0xc8] sm:$0xff]  ;;  %v2065_v48 = vpop.eup %2064  ;;  %v3508_v26 = vadd.s32 %v3215_v0, %v3388_v62  ;;  %2084 = vlog2.f32 %v1336_v46 }
 0x1ba   : > { %4921 = vst [vmem:[#allocation114_spill] sm:$0xff] %v3501_v23  ;;  %4922 = vst [vmem:[#allocation115_spill] sm:$0xff] %v3504_v24  ;;  %v3510_v39 = vmul.f32 0.6931472, %v2055_v20  ;;  %v3513_v49 = vld [vmem:[%s2627_s9 + $0xb8] sm:$0xff]  ;;  %vm4780_vm12 = vcmp.gt.f32.partialorder %v3480_v35, 0.0  ;;  %v2067_v3 = vpop.eup %2066  ;;  %2086 = vlog2.f32 %v1337_v50 }
 0x1bb   : > { %4923 = vst [vmem:[#allocation116_spill] sm:$0xff] %v3508_v26  ;;  %4924 = vst [vmem:[#allocation117_spill] sm:$0xff] %v3513_v49  ;;  %v3517_v60 = vld [vmem:[%s2637_s13 + $0xd0] sm:$0xff]  ;;  %v3519_v56 = vmul.f32 0.6931472, %v2057_v47  ;;  %v1339_v15 = vsel %vm4770_vm14, %v3463_v21, 1.0  ;;  %v2069_v62 = vpop.eup %2068  ;;  %2088 = vlog2.f32 %v1338_v31 }
 0x1bc   : > { %4925 = vst [vmem:[#allocation118_spill] sm:$0xff] %v3517_v60  ;;  %vm4799_vm13 = vcmp.gt.f32.partialorder %v3489_v27, 0.0  ;;  %v465_v46 = vadd.s32 40, %v3173_v53  ;;  %4927 = vst [vmem:[#allocation120_spill] sm:$0xff] %v3527_v52  ;;  %vm4797_vm11 = vcmp.gt.f32.partialorder %v3501_v23, 0.0  ;;  %vm4796_vm15 = vcmp.gt.f32.partialorder %v3504_v24, 0.0  ;;  %v2071_v47 = vpop.eup %2070 }
 0x1bd   : > { %4926 = vst [vmem:[#allocation119_spill] sm:$0xff] %v3519_v56  ;;  %vm4798_vm14 = vcmp.gt.f32.partialorder %v3513_v49, 0.0  ;;  %v770_v50 = vsel %vm4780_vm12, %v3480_v35, 1.0  ;;  %vm4793_vm10 = vcmp.gt.f32.partialorder %v3517_v60, 0.0  ;;  %v2073_v21 = vpop.eup %2072  ;;  %v3536_v31 = vmul.f32 0.6931472, %v2059_v9 }
 0x1be   : > { %v3538_v56 = vmul.f32 0.6931472, %v2061_v12  ;;  %v771_v33 = vsel %vm4799_vm13, %v3489_v27, 1.0  ;;  %v3543_v36 = vmul.f32 0.6931472, %v2063_v11  ;;  %vm4800_vm9 = vcmp.gt.f32.partialorder %v3527_v52, 0.0 }
 0x1bf   : > { %4928 = vst [vmem:[#allocation121_spill] sm:$0xff] %v3536_v31  ;;  %v3550_v35 = vld [vmem:[%s2637_s13 + $0xe0] sm:$0xff]  ;;  %vm477_vm12 = vcmp.lt.s32.totalorder %v3239_v40, 136  ;;  %v772_v12 = vsel %vm4798_vm14, %v3513_v49, 1.0  ;;  %v1342_v11 = vsel %vm4793_vm10, %v3517_v60, 1.0  ;;  %v466_v60 = vadd.s32 48, %v3173_v53 }
 0x1c0   : > { %4929 = vst [vmem:[#allocation122_spill] sm:$0xff] %v3538_v56  ;;  %4930 = vst [vmem:[#allocation123_spill] sm:$0xff] %v3543_v36  ;;  %v3566_v56 = vadd.s32 %v3215_v0, %v465_v46  ;;  %v3568_v31 = vmul.f32 0.6931472, %v2065_v48  ;;  %v3570_v49 = vmul.f32 0.6931472, %v2067_v3 }
 0x1c1   : > { %4931 = vst [vmem:[#allocation124_spill] sm:$0xff] %v3550_v35  ;;  %vm1312_vm10 = vcmp.gt.f32.partialorder %v3550_v35, 0.0  ;;  %v3583_v48 = vmul.f32 0.6931472, %v2071_v47  ;;  %v3585_v3 = vmul.f32 0.6931472, %v2073_v21 }
 0x1c2   : > { %vm4811_vm13 = vcmp.gt.f32.partialorder %v3579_v13, 0.0  ;;  %v1344_v21 = vsel %vm1312_vm10, %v3550_v35, 1.0  ;;  %v490_v40 = vld [vmem:[%s4510_s14 + $0x28] sm:$0xff] }
 0x1f4   : > { %v660_v26 = vpop.xlane.xlu1 %659 }
 0x1f5   : > { %v656_v20 = vpop.xlane.xlu0 %655 }
 0x1f6   : > { %2090 = vlog2.f32 %v656_v20  ;;  %v2075_v20 = vpop.eup %2074 }
 0x1f7   : > { %2092 = vlog2.f32 %v660_v26  ;;  %v1340_v26 = vsel %vm4797_vm11, %v3501_v23, 1.0  ;;  %v2077_v9 = vpop.eup %2076  ;;  %v3563_v23 = vld [vmem:[%s2637_s13 + $0xe8] sm:$0xff] }
 0x1f8   : > { %2094 = vlog2.f32 %v1339_v15  ;;  %v1341_v15 = vsel %vm4796_vm15, %v3504_v24, 1.0  ;;  %4932 = vst [vmem:[#allocation125_spill] sm:$0xff] %v3563_v23  ;;  %v2079_v27 = vpop.eup %2078  ;;  %v3575_v24 = vmul.f32 0.6931472, %v2069_v62  ;;  %vm478_vm15 = vcmp.lt.s32.totalorder %v3249_v45, 136 }
 0x1f9   : > { %2096 = vlog2.f32 %v770_v50  ;;  %v664_v36 = vpop.xlane.xlu1 %663  ;;  %v3573_v50 = vld [vmem:[%s2637_s13 + $0xf0] sm:$0xff]  ;;  %v2081_v29 = vpop.eup %2080  ;;  %vm4813_vm11 = vcmp.gt.f32.partialorder %v3563_v23, 0.0  ;;  %v1343_v62 = vsel %vm4800_vm9, %v3527_v52, 1.0  ;;  %vm479_vm9 = vcmp.lt.s32.totalorder %v3261_v58, 136  ;;  %s2258_s13 = scalar_lea.vmem %s4554_s15, 128 }
 0x1fa   : > { %2098 = vlog2.f32 %v771_v33  ;;  %4933 = vst [vmem:[#allocation126_spill] sm:$0xff] %v3573_v50  ;;  %4934 = vst [vmem:[#allocation127_spill] sm:$0xff] %v3575_v24  ;;  %v2083_v18 = vpop.eup %2082  ;;  %vm4812_vm14 = vcmp.gt.f32.partialorder %v3573_v50, 0.0  ;;  %v3594_v24 = vmul.f32 0.6931472, %v2077_v9  ;;  %p2259_p5 = scmp.ne.s32.totalorder %s4554_s15, %s2258_s13  ;;  %p2266_p4 = scmp.lt.s32.totalorder %s2264_s28, %s2258_s13 }
 0x1fb   : > { %2100 = vlog2.f32 %v664_v36  ;;  %v2085_v33 = vpop.eup %2084  ;;  %v3588_v36 = vmul.f32 0.6931472, %v2075_v20  ;;  %v3601_v20 = vadd.s32 %v3215_v0, %v466_v60  ;;  %v3611_v52 = vmul.f32 0.6931472, %v2083_v18 }
 0x1fc   : > { %2102 = vlog2.f32 %v772_v12  ;;  %v2087_v46 = vpop.eup %2086  ;;  %4936 = vst [vmem:[#allocation129_spill] sm:$0xff] %v3594_v24  ;;  %v3603_v12 = vmul.f32 0.6931472, %v2079_v27  ;;  %v1346_v60 = vsel %vm4812_vm14, %v3573_v50, 1.0  ;;  %v3626_v18 = vadd.s32 56, %v3173_v53  ;;  %vm3652_vm14 = vmand %vm477_vm12, %vm726_vm1  ;;  %p2260_p7 = pnand %p2259_p5, %p5249_p3  ;;  %p2267_p10 = por %p2266_p4, %p2265_p13 }
 0x1fd   : > { %2104 = vlog2.f32 %v1340_v26  ;;  %v2089_v47 = vpop.eup %2088  ;;  %v1345_v26 = vsel %vm4813_vm11, %v3563_v23, 1.0  ;;  %4939 = vst [vmem:[#allocation132_spill] sm:$0xff] %v3611_v52  ;;  %v4944_v52 = vld [vmem:[#allocation19_spill] sm:$0xff]  ;;  %vm3677_vm1 = vmand %vm478_vm15, %vm728_vm3 }
 0x1fe   : > { %2106 = vlog2.f32 %v1341_v15  ;;  %4937 = vst [vmem:[#allocation130_spill] sm:$0xff] %v3603_v12  ;;  %v3609_v15 = vmul.f32 0.6931472, %v2081_v29  ;;  %v3616_v12 = vmul.f32 0.6931472, %v2085_v33  ;;  %vm3704_vm3 = vmand %vm478_vm15, %vm730_vm5  ;;  %p2261_p9 = pneg %p2260_p7 }
 0x1ff   : > { %2108 = vlog2.f32 %v1342_v11  ;;  %v1347_v11 = vsel %vm4811_vm13, %v3579_v13, 1.0  ;;  %v4942_v13 = vld [vmem:[#allocation17_spill] sm:$0xff]  ;;  %vm3644_vm13 = vmand %vm477_vm12, %vm725_vm0 }
 0x200   : > { %v2091_v9 = vpop.eup %2090  ;;  %4938 = vst [vmem:[#allocation131_spill] sm:$0xff] %v3609_v15  ;;  %2110 = vlog2.f32 %v1343_v62  ;;  %4940 = vst [vmem:[#allocation133_spill] sm:$0xff] %v3616_v12  ;;  %v3623_v15 = vmul.f32 0.6931472, %v2087_v46  ;;  %v3633_v12 = vmul.f32 0.6931472, %v2089_v47  ;;  %p2268_p2 = pnand %p2267_p10, %p2261_p9 }
 0x201   : > { %v2093_v35 = vpop.eup %2092  ;;  %v686_v27 = vmul.f32 0.6931472, %v2091_v9  ;;  %2112 = vlog2.f32 %v1344_v21  ;;  %v4943_v46 = vld [vmem:[#allocation18_spill] sm:$0xff]  ;;  %v1200_v24 = vpop.xlane.xlu0 %1199  ;;  %vm3663_vm0 = vmand %vm477_vm12, %vm727_vm2 }
 0x202   : > { %v3621_v23 = vpop.eup %2094  ;;  %v688_v29 = vmul.f32 0.6931472, %v2093_v35  ;;  %4941 = vst [vmem:[#allocation134_spill] sm:$0xff] %v3623_v15  ;;  %2114 = vlog2.f32 %v1345_v26  ;;  %vm3688_vm2 = vmand %vm478_vm15, %vm729_vm4 }
 0x203   : > { %v3628_v62 = vpop.eup %2096  ;;  %v701_v9 = vsub.f32 %v2877_v63, %v686_v27  ;;  %v702_v33 = vsub.f32 %v2880_v30, %v686_v27  ;;  %v703_v50 = vsub.f32 %v2883_v32, %v686_v27  ;;  %2116 = vlog2.f32 %v1346_v60  ;;  %vm3717_vm4 = vmand %vm479_vm9, %vm731_vm6 }
 0x204   : > { %v3635_v21 = vpop.eup %2098  ;;  %v704_v35 = vsub.f32 %v4942_v13, %v688_v29  ;;  %v705_v15 = vsub.f32 %v4943_v46, %v688_v29  ;;  %v706_v53 = vsub.f32 %v4944_v52, %v688_v29  ;;  %2118 = vlog2.f32 %v1200_v24  ;;  %vm3727_vm5 = vmand %vm479_vm9, %vm732_vm7 }
 0x205   : > { %v2101_v30 = vpop.eup %2100  ;;  %v861_v13 = vsub.f32 %v3258_v10, %v701_v9  ;;  %v862_v52 = vsub.f32 %v3269_v7, %v702_v33  ;;  %v863_v47 = vsub.f32 %v3278_v55, %v703_v50  ;;  %2120 = vlog2.f32 %v1347_v11  ;;  %vm3746_vm6 = vmand %vm479_vm9, %vm733_vm8 }
 0x206   : > { %v2103_v26 = vpop.eup %2102  ;;  %v690_v27 = vmul.f32 0.6931472, %v2101_v30  ;;  %v864_v60 = vsub.f32 %v3287_v38, %v704_v35  ;;  %v865_v29 = vsub.f32 %v3296_v14, %v705_v15  ;;  %v866_v10 = vsub.f32 %v3305_v16, %v706_v53 }
 0x207   : > { %v2105_v9 = vpop.eup %2104  ;;  %v885_v7 = vmul.f32 %v861_v13, %v3104_v51  ;;  %v886_v55 = vmul.f32 %v862_v52, %v3107_v57  ;;  %v887_v50 = vmul.f32 %v863_v47, %v3110_v44  ;;  %v668_v35 = vpop.xlane.xlu1 %667  ;;  %vm480_vm7 = vcmp.lt.s32.totalorder %v3493_v17, 136 }
 0x208   : > { %v2107_v38 = vpop.eup %2106  ;;  %v707_v14 = vsub.f32 %v2891_v4, %v690_v27  ;;  %v708_v16 = vsub.f32 %v2894_v5, %v690_v27  ;;  %v709_v51 = vsub.f32 %v2897_v6, %v690_v27  ;;  %v888_v44 = vmul.f32 %v864_v60, %v3114_v37  ;;  %v1210_v53 = vpop.xlane.xlu0 %1209 }
 0x209   : > { %v2109_v15 = vpop.eup %2108  ;;  %v909_v11 = vsel %vm3644_vm13, %v885_v7, 0.0  ;;  %v910_v4 = vsel %vm3652_vm14, %v886_v55, 0.0  ;;  %v911_v5 = vsel %vm3663_vm0, %v887_v50, 0.0  ;;  %v889_v6 = vmul.f32 %v865_v29, %v3118_v2 }
 0x20a   : > { %v2111_v46 = vpop.eup %2110  ;;  %2122 = vlog2.f32 %v668_v35  ;;  %v933_v30 = vadd.f32 %v910_v4, %v909_v11  ;;  %v890_v63 = vmul.f32 %v866_v10, %v3122_v19  ;;  %v912_v32 = vsel %vm3677_vm1, %v888_v44, 0.0 }
 0x20b   : > { %v2113_v13 = vpop.eup %2112  ;;  %2124 = vlog2.f32 %v1210_v53  ;;  %v913_v2 = vsel %vm3688_vm2, %v889_v6, 0.0  ;;  %v867_v47 = vsub.f32 %v3314_v61, %v707_v14  ;;  %v868_v19 = vsub.f32 %v3323_v34, %v708_v16 }
 0x20c   : > { %v2115_v27 = vpop.eup %2114  ;;  %v934_v24 = vadd.f32 %v933_v30, %v911_v5  ;;  %v937_v60 = vadd.f32 %v913_v2, %v912_v32  ;;  %v869_v10 = vsub.f32 %v3332_v42, %v709_v51  ;;  %v3733_v7 = vmul.f32 0.6931472, %v3621_v23  ;;  %v1215_v14 = vpop.xlane.xlu0 %1214  ;;  %v4971_v30 = vld [vmem:[#allocation20_spill] sm:$0xff] }
 0x20d   : > { %v914_v61 = vsel %vm3704_vm3, %v890_v63, 0.0  ;;  %v891_v34 = vmul.f32 %v867_v47, %v3129_v59  ;;  %v892_v55 = vmul.f32 %v868_v19, %v3136_v1  ;;  %v3740_v50 = vmul.f32 0.6931472, %v3628_v62  ;;  %v2117_v33 = vpop.eup %2116  ;;  %v4973_v47 = vld [vmem:[#allocation22_spill] sm:$0xff]  ;;  %v4980_v42 = vld [vmem:[#allocation32_spill] sm:$0xff] }
 0x20e   : > { %4961 = vst [vmem:[#allocation17_spill] sm:$0xff] %v3733_v7  ;;  %935 = vadd.xlane.f32.xlu0 %v934_v24  ;;  %v938_v16 = vadd.f32 %v937_v60, %v914_v61  ;;  %v893_v23 = vmul.f32 %v869_v10, %v3143_v22  ;;  %v3753_v59 = vmul.f32 0.6931472, %v3635_v21  ;;  %v3755_v1 = vmul.f32 0.6931472, %v2103_v26  ;;  %v2119_v62 = vpop.eup %2118  ;;  %v1205_v51 = vpop.xlane.xlu1 %1204  ;;  %v5050_v7 = vld [vmem:[#allocation70_spill] sm:$0xff] }
 0x20f   : > { %4962 = vst [vmem:[#allocation18_spill] sm:$0xff] %v3740_v50  ;;  %2126 = vlog2.f32 %v1215_v14  ;;  %v915_v57 = vsel %vm3717_vm4, %v891_v34, 0.0  ;;  %v916_v44 = vsel %vm3727_vm5, %v892_v55, 0.0  ;;  %v3761_v35 = vmul.f32 0.6931472, %v2105_v9  ;;  %v2121_v21 = vpop.eup %2120 }
 0x210   : > { %4965 = vst [vmem:[#allocation19_spill] sm:$0xff] %v3753_v59  ;;  %4966 = vst [vmem:[#allocation135_spill] sm:$0xff] %v3755_v1  ;;  %v1237_v11 = vmul.f32 0.6931472, %v2119_v62  ;;  %2128 = vlog2.f32 %v1205_v51  ;;  %939 = vadd.xlane.f32.xlu1 %v938_v16  ;;  %v941_v22 = vadd.f32 %v916_v44, %v915_v57  ;;  %v3763_v4 = vmul.f32 0.6931472, %v2107_v38  ;;  %v1220_v63 = vpop.xlane.xlu0 %1219 }
 0x211   : > { %4967 = vst [vmem:[#allocation136_spill] sm:$0xff] %v3761_v35  ;;  %v917_v26 = vsel %vm3746_vm6, %v893_v23, 0.0  ;;  %v3769_v5 = vadd.s32 %v3215_v0, %v3626_v18  ;;  %v3771_v6 = vmul.f32 0.6931472, %v2109_v15  ;;  %v3773_v53 = vmul.f32 0.6931472, %v2111_v46 }
 0x212   : > { %4968 = vst [vmem:[#allocation137_spill] sm:$0xff] %v3763_v4  ;;  %v1252_v9 = vsub.f32 %v2904_v8, %v1237_v11  ;;  %v1253_v37 = vsub.f32 %v4971_v30, %v1237_v11  ;;  %v942_v32 = vadd.f32 %v941_v22, %v917_v26  ;;  %v4972_v38 = vld [vmem:[#allocation21_spill] sm:$0xff]  ;;  %2130 = vlog2.f32 %v1220_v63  ;;  %v672_v52 = vpop.xlane.xlu1 %671  ;;  %v4982_v62 = vld [vmem:[#allocation27_spill] sm:$0xff]  ;;  %v4983_v57 = vld [vmem:[#allocation28_spill] sm:$0xff] }
 0x213   : > { %4969 = vst [vmem:[#allocation138_spill] sm:$0xff] %v3771_v6  ;;  %4970 = vst [vmem:[#allocation139_spill] sm:$0xff] %v3773_v53  ;;  %v1254_v2 = vsub.f32 %v4972_v38, %v1237_v11  ;;  %v1255_v19 = vsub.f32 %v4973_v47, %v1237_v11  ;;  %v3779_v24 = vmul.f32 0.6931472, %v2113_v13  ;;  %v3781_v0 = vmul.f32 0.6931472, %v2115_v27 }
 0x214   : > { %v2123_v18 = vpop.eup %2122  ;;  %2132 = vlog2.f32 %v672_v52  ;;  %943 = vadd.xlane.f32.xlu0 %v942_v32  ;;  %v1444_v15 = vsub.f32 %v3474_v41, %v1252_v9  ;;  %v1445_v8 = vsub.f32 %v3482_v43, %v1253_v37  ;;  %v3789_v61 = vmul.f32 0.6931472, %v2117_v33  ;;  %v4978_v43 = vld [vmem:[#allocation78_spill] sm:$0xff]  ;;  %v4981_v23 = vld [vmem:[#allocation33_spill] sm:$0xff]  ;;  %v4986_v37 = vld [vmem:[#allocation64_spill] sm:$0xff] }
 0x215   : > { %4974 = vst [vmem:[#allocation20_spill] sm:$0xff] %v3779_v24  ;;  %4975 = vst [vmem:[#allocation21_spill] sm:$0xff] %v3781_v0  ;;  %v1446_v46 = vsub.f32 %v3495_v28, %v1254_v2  ;;  %v2125_v60 = vpop.eup %2124  ;;  %v692_v29 = vmul.f32 0.6931472, %v2123_v18  ;;  %v3787_v10 = vsub.f32 %v3510_v39, %v1255_v19  ;;  %v3791_v13 = vmul.f32 0.6931472, %v2121_v21 }
 0x216   : > { %4976 = vst [vmem:[#allocation22_spill] sm:$0xff] %v3789_v61  ;;  %v1241_v27 = vmul.f32 0.6931472, %v2125_v60  ;;  %v3794_v55 = vmul.f32 %v1444_v15, %v3267_v54  ;;  %v3797_v41 = vmul.f32 %v1445_v8, %v3276_v25  ;;  %v4979_v28 = vld [vmem:[#allocation31_spill] sm:$0xff]  ;;  %v4984_v22 = vld [vmem:[#allocation29_spill] sm:$0xff]  ;;  %v4985_v26 = vld [vmem:[#allocation30_spill] sm:$0xff] }
 0x217   : > { %4977 = vst [vmem:[#allocation140_spill] sm:$0xff] %v3791_v13  ;;  %v1225_v34 = vpop.xlane.xlu0 %1224  ;;  %v3800_v14 = vmul.f32 %v1446_v46, %v4978_v43  ;;  %v710_v16 = vsub.f32 %v4979_v28, %v692_v29  ;;  %v711_v39 = vsub.f32 %v4980_v42, %v692_v29  ;;  %v712_v33 = vsub.f32 %v4981_v23, %v692_v29  ;;  %v4990_v32 = vld [vmem:[#allocation86_spill] sm:$0xff]  ;;  %v4991_v2 = vld [vmem:[#allocation88_spill] sm:$0xff]  ;;  %v4993_v8 = vld [vmem:[#allocation65_spill] sm:$0xff] }
 0x218   : > { %2134 = vlog2.f32 %v1225_v34  ;;  %v1260_v51 = vsub.f32 %v4982_v62, %v1241_v27  ;;  %v1261_v44 = vsub.f32 %v4983_v57, %v1241_v27  ;;  %v1262_v21 = vsub.f32 %v4984_v22, %v1241_v27  ;;  %v4992_v47 = vld [vmem:[#allocation90_spill] sm:$0xff]  ;;  %v4997_v60 = vld [vmem:[#allocation107_spill] sm:$0xff]  ;;  %v5013_v13 = vld [vmem:[#allocation92_spill] sm:$0xff] }
 0x219   : > { %v676_v11 = vpop.xlane.xlu1 %675  ;;  %v1263_v9 = vsub.f32 %v4985_v26, %v1241_v27  ;;  %v2127_v30 = vpop.eup %2126  ;;  %vm4987_vm8 = vcmp.gt.f32.partialorder %v4986_v37, 0.0  ;;  %v870_v38 = vsub.f32 %v4990_v32, %v710_v16  ;;  %v871_v52 = vsub.f32 %v4991_v2, %v711_v39  ;;  %v4998_v27 = vld [vmem:[#allocation108_spill] sm:$0xff]  ;;  %v4999_v28 = vld [vmem:[#allocation110_spill] sm:$0xff]  ;;  %v5007_v26 = vld [vmem:[#allocation111_spill] sm:$0xff] }
 0x21a   : > { %2136 = vlog2.f32 %v676_v11  ;;  %vm3813_vm13 = vmand %vm480_vm7, %vm4987_vm8  ;;  %v872_v19 = vsub.f32 %v4992_v47, %v712_v33  ;;  %v2129_v18 = vpop.eup %2128  ;;  %v3820_v15 = vmul.f32 0.6931472, %v2127_v30  ;;  %vm4994_vm14 = vcmp.gt.f32.partialorder %v4993_v8, 0.0  ;;  %v5000_v39 = vld [vmem:[#allocation66_spill] sm:$0xff]  ;;  %v5005_v11 = vld [vmem:[#allocation35_spill] sm:$0xff] }
 0x21b   : > { %vm3826_vm0 = vmand %vm480_vm7, %vm4994_vm14  ;;  %v1452_v29 = vsub.f32 %v4997_v60, %v1260_v51  ;;  %v3832_v34 = vsub.f32 %v4998_v27, %v1261_v44  ;;  %v3835_v16 = vsub.f32 %v4999_v28, %v1262_v21  ;;  %v1239_v42 = vmul.f32 0.6931472, %v2129_v18  ;;  %v5004_v57 = vld [vmem:[#allocation34_spill] sm:$0xff]  ;;  %v5006_v21 = vld [vmem:[#allocation116_spill] sm:$0xff] }
 0x21c   : > { %vm5001_vm1 = vcmp.gt.f32.partialorder %v5000_v39, 0.0  ;;  %v894_v33 = vmul.f32 %v870_v38, %v4986_v37  ;;  %v895_v62 = vmul.f32 %v871_v52, %v4993_v8  ;;  %v896_v51 = vmul.f32 %v872_v19, %v5000_v39  ;;  %v5008_v32 = vld [vmem:[#allocation73_spill] sm:$0xff]  ;;  %v2131_v47 = vpop.eup %2130  ;;  %v5009_v37 = vld [vmem:[#allocation23_spill] sm:$0xff]  ;;  %v5010_v52 = vld [vmem:[#allocation24_spill] sm:$0xff] }
 0x21d   : > { %vm3841_vm2 = vmand %vm480_vm7, %vm5001_vm1  ;;  %vm481_vm3 = vcmp.lt.s32.totalorder %v5006_v21, 136  ;;  %v3854_v30 = vsub.f32 %v5007_v26, %v1263_v9  ;;  %v3857_v2 = vmul.f32 %v1452_v29, %v5008_v32  ;;  %v1256_v38 = vsub.f32 %v5009_v37, %v1239_v42  ;;  %v5011_v37 = vld [vmem:[#allocation25_spill] sm:$0xff]  ;;  %v5017_v23 = vld [vmem:[#allocation38_spill] sm:$0xff] }
 0x21e   : > { %v1257_v18 = vsub.f32 %v5010_v52, %v1239_v42  ;;  %v1230_v19 = vpop.xlane.xlu0 %1229  ;;  %v918_v8 = vsel %vm3813_vm13, %v894_v33, 0.0  ;;  %v919_v60 = vsel %vm3826_vm0, %v895_v62, 0.0  ;;  %v2133_v27 = vpop.eup %2132  ;;  %v3865_v28 = vmul.f32 0.6931472, %v2131_v47  ;;  %v5012_v52 = vld [vmem:[#allocation26_spill] sm:$0xff]  ;;  %v5018_v62 = vld [vmem:[#allocation39_spill] sm:$0xff] }
 0x21f   : > { %2138 = vlog2.f32 %v1230_v19  ;;  %v920_v9 = vsel %vm3841_vm2, %v896_v51, 0.0  ;;  %v945_v29 = vadd.f32 %v919_v60, %v918_v8  ;;  %v694_v39 = vmul.f32 0.6931472, %v2133_v27  ;;  %v5019_v19 = vld [vmem:[#allocation75_spill] sm:$0xff]  ;;  %v5025_v27 = vld [vmem:[#allocation44_spill] sm:$0xff]  ;;  %v5041_v53 = vld [vmem:[#allocation69_spill] sm:$0xff] }
 0x220   : > { %v680_v26 = vpop.xlane.xlu1 %679  ;;  %v1258_v22 = vsub.f32 %v5011_v37, %v1239_v42  ;;  %v1259_v44 = vsub.f32 %v5012_v52, %v1239_v42  ;;  %v1448_v63 = vsub.f32 %v5013_v13, %v1256_v38  ;;  %vm5014_vm4 = vcmp.gt.f32.partialorder %v5008_v32, 0.0  ;;  %v5023_v32 = vld [vmem:[#allocation42_spill] sm:$0xff]  ;;  %v5024_v8 = vld [vmem:[#allocation43_spill] sm:$0xff]  ;;  %v5031_v51 = vld [vmem:[#allocation76_spill] sm:$0xff] }
 0x221   : > { %vm3876_vm5 = vmand %vm479_vm9, %vm5014_vm4  ;;  %2140 = vlog2.f32 %v680_v26  ;;  %v946_v47 = vadd.f32 %v945_v29, %v920_v9  ;;  %vm5020_vm6 = vcmp.gt.f32.partialorder %v5019_v19, 0.0  ;;  %v713_v38 = vsub.f32 %v5023_v32, %v694_v39  ;;  %v5026_v52 = vld [vmem:[#allocation67_spill] sm:$0xff]  ;;  %v5045_v6 = vld [vmem:[#allocation101_spill] sm:$0xff] }
 0x222   : > { %vm3888_vm8 = vmand %vm479_vm9, %vm5020_vm6  ;;  %v2135_v42 = vpop.eup %2134  ;;  %v714_v60 = vsub.f32 %v5024_v8, %v694_v39  ;;  %v715_v37 = vsub.f32 %v5025_v27, %v694_v39  ;;  %vm5027_vm13 = vcmp.gt.f32.partialorder %v5026_v52, 0.0  ;;  %v5030_v29 = vld [vmem:[#allocation95_spill] sm:$0xff]  ;;  %vm5032_vm0 = vcmp.gt.f32.partialorder %v5031_v51, 0.0  ;;  %v5035_v39 = vld [vmem:[#allocation68_spill] sm:$0xff] }
 0x223   : > { %vm3899_vm14 = vmand %vm478_vm15, %vm5027_vm13  ;;  %v1449_v26 = vsub.f32 %v5030_v29, %v1257_v18  ;;  %v3912_v8 = vmul.f32 0.6931472, %v2135_v42  ;;  %947 = vadd.xlane.f32.xlu0 %v946_v47  ;;  %vm5036_vm2 = vcmp.gt.f32.partialorder %v5035_v39, 0.0  ;;  %v5039_v18 = vld [vmem:[#allocation97_spill] sm:$0xff]  ;;  %v5040_v33 = vld [vmem:[#allocation99_spill] sm:$0xff]  ;;  %v1480_v0 = vmul.f32 %v1448_v63, %v5026_v52 }
 0x224   : > { %vm3908_vm1 = vmand %vm479_vm9, %vm5032_vm0  ;;  %v1450_v29 = vsub.f32 %v5039_v18, %v1258_v22  ;;  %v1451_v61 = vsub.f32 %v5040_v33, %v1259_v44  ;;  %v2137_v24 = vpop.eup %2136  ;;  %vm5042_vm6 = vcmp.gt.f32.partialorder %v5041_v53, 0.0  ;;  %v873_v4 = vsub.f32 %v5045_v6, %v713_v38  ;;  %v5046_v35 = vld [vmem:[#allocation103_spill] sm:$0xff]  ;;  %v5047_v22 = vld [vmem:[#allocation105_spill] sm:$0xff] }
 0x225   : > { %vm3918_vm4 = vmand %vm478_vm15, %vm5036_vm2  ;;  %v1481_v42 = vmul.f32 %v1449_v26, %v5035_v39  ;;  %v874_v1 = vsub.f32 %v5046_v35, %v714_v60  ;;  %v875_v18 = vsub.f32 %v5047_v22, %v715_v37  ;;  %v5048_v44 = vld [vmem:[#allocation45_spill] sm:$0xff]  ;;  %v5049_v33 = vld [vmem:[#allocation46_spill] sm:$0xff]  ;;  %v3941_v59 = vmul.f32 0.6931472, %v2137_v24  ;;  %v1235_v50 = vpop.xlane.xlu0 %1234 }
 0x226   : > { %vm3929_vm13 = vmand %vm478_vm15, %vm5042_vm6  ;;  %vm5051_vm0 = vcmp.gt.f32.partialorder %v5050_v7, 0.0  ;;  %v1482_v35 = vmul.f32 %v1450_v29, %v5041_v53  ;;  %2142 = vlog2.f32 %v1235_v50  ;;  %v1483_v6 = vmul.f32 %v1451_v61, %v5050_v7  ;;  %v5054_v60 = vld [vmem:[#allocation71_spill] sm:$0xff]  ;;  %v5058_v39 = vld [vmem:[#allocation49_spill] sm:$0xff] }
 0x227   : > { %vm3947_vm2 = vmand %vm478_vm15, %vm5051_vm0  ;;  %v1512_v38 = vsel %vm3899_vm14, %v1480_v0, 0.0  ;;  %v1513_v24 = vsel %vm3918_vm4, %v1481_v42, 0.0  ;;  %vm5055_vm6 = vcmp.gt.f32.partialorder %v5054_v60, 0.0  ;;  %v5059_v50 = vld [vmem:[#allocation50_spill] sm:$0xff]  ;;  %v5060_v61 = vld [vmem:[#allocation51_spill] sm:$0xff]  ;;  %v684_v9 = vpop.xlane.xlu1 %683 }
 0x228   : > { %vm3961_vm11 = vmand %vm481_vm3, %vm5055_vm6  ;;  %v1514_v27 = vsel %vm3929_vm13, %v1482_v35, 0.0  ;;  %v5061_v29 = vld [vmem:[#allocation72_spill] sm:$0xff]  ;;  %2144 = vlog2.f32 %v684_v9  ;;  %v1515_v22 = vsel %vm3947_vm2, %v1483_v6, 0.0  ;;  %v1545_v52 = vadd.f32 %v1513_v24, %v1512_v38  ;;  %v5065_v63 = vld [vmem:[#allocation74_spill] sm:$0xff] }
 0x229   : > { %vm5062_vm14 = vcmp.gt.f32.partialorder %v5061_v29, 0.0  ;;  %vm5066_vm0 = vcmp.gt.f32.partialorder %v5065_v63, 0.0  ;;  %v897_v35 = vmul.f32 %v873_v4, %v5054_v60  ;;  %v2139_v0 = vpop.eup %2138  ;;  %v898_v7 = vmul.f32 %v874_v1, %v5061_v29  ;;  %v5069_v9 = vld [vmem:[#allocation77_spill] sm:$0xff]  ;;  %v5084_v29 = vld [vmem:[#allocation79_spill] sm:$0xff]  ;;  %v5088_v42 = vld [vmem:[#allocation56_spill] sm:$0xff] }
 0x22a   : > { %vm3977_vm4 = vmand %vm481_vm3, %vm5062_vm14  ;;  %v899_v53 = vmul.f32 %v875_v18, %v5065_v63  ;;  %vm5070_vm13 = vcmp.gt.f32.partialorder %v5069_v9, 0.0  ;;  %v1485_v6 = vmul.f32 %v3832_v34, %v5019_v19  ;;  %v1486_v38 = vmul.f32 %v3835_v16, %v5031_v51  ;;  %v5080_v37 = vld [vmem:[#allocation53_spill] sm:$0xff] }
 0x22b   : > { %vm3987_vm6 = vmand %vm481_vm3, %vm5066_vm0  ;;  %v4006_v4 = vmul.f32 0.6931472, %v2139_v0  ;;  %v1546_v24 = vadd.f32 %v1545_v52, %v1514_v27  ;;  %v921_v1 = vsel %vm3961_vm11, %v897_v35, 0.0  ;;  %v1487_v18 = vmul.f32 %v3854_v30, %v5069_v9  ;;  %v2141_v34 = vpop.eup %2140  ;;  %v5079_v52 = vld [vmem:[#allocation52_spill] sm:$0xff]  ;;  %v5089_v32 = vld [vmem:[#allocation57_spill] sm:$0xff] }
 0x22c   : > { %vm3998_vm2 = vmand %vm479_vm9, %vm5070_vm13  ;;  %vm5073_vm14 = vcmp.gt.f32.partialorder %v3267_v54, 0.0  ;;  %v922_v16 = vsel %vm3977_vm4, %v898_v7, 0.0  ;;  %v923_v51 = vsel %vm3987_vm6, %v899_v53, 0.0  ;;  %v1516_v19 = vsel %vm3876_vm5, %v3857_v2, 0.0  ;;  %v5090_v35 = vld [vmem:[#allocation58_spill] sm:$0xff]  ;;  %v5092_v63 = vld [vmem:[#allocation37_spill] sm:$0xff] }
 0x22d   : > { %vm4016_vm0 = vmand %vm477_vm12, %vm5073_vm14  ;;  %v1517_v54 = vsel %vm3888_vm8, %v1485_v6, 0.0  ;;  %vm5076_vm11 = vcmp.gt.f32.partialorder %v3276_v25, 0.0  ;;  %v1276_v60 = vsub.f32 %v5079_v52, %v4006_v4  ;;  %v1277_v53 = vsub.f32 %v5080_v37, %v4006_v4  ;;  %v5098_v25 = vld [vmem:[#allocation119_spill] sm:$0xff]  ;;  %v5222_v52 = vld [vmem:[#allocation138_spill] sm:$0xff] }
 0x22e   : > { %vm4033_vm13 = vmand %vm477_vm12, %vm5076_vm11  ;;  %v4041_v7 = vmul.f32 0.6931472, %v2141_v34  ;;  %v1547_v2 = vadd.f32 %v1546_v24, %v1515_v22  ;;  %vm5081_vm5 = vcmp.gt.f32.partialorder %v4978_v43, 0.0  ;;  %v949_v46 = vadd.f32 %v922_v16, %v921_v1 }
 0x22f   : > { %vm4047_vm8 = vmand %vm477_vm12, %vm5081_vm5  ;;  %v1518_v13 = vsel %vm3908_vm1, %v1486_v38, 0.0  ;;  %v1519_v0 = vsel %vm3998_vm2, %v1487_v18, 0.0  ;;  %v1550_v27 = vadd.f32 %v1517_v54, %v1516_v19  ;;  %vm5085_vm4 = vcmp.gt.f32.partialorder %v5084_v29, 0.0 }
 0x230   : > { %vm4059_vm6 = vmand %vm477_vm12, %vm5085_vm4  ;;  %vm482_vm14 = vcmp.lt.s32.totalorder %v3566_v56, 136  ;;  %v719_v22 = vsub.f32 %v5088_v42, %v4041_v7  ;;  %v720_v47 = vsub.f32 %v5089_v32, %v4041_v7  ;;  %v721_v9 = vsub.f32 %v5090_v35, %v4041_v7  ;;  %1548 = vadd.xlane.f32.xlu1 %v1547_v2  ;;  %v2143_v18 = vpop.eup %2142 }
 0x231   : > { %v1479_v26 = vmul.f32 %v3787_v10, %v5084_v29  ;;  %v950_v6 = vadd.f32 %v949_v46, %v923_v51  ;;  %v1551_v38 = vadd.f32 %v1550_v27, %v1518_v13  ;;  %v1508_v24 = vsel %vm4016_vm0, %v3794_v55, 0.0  ;;  %v5091_v10 = vld [vmem:[#allocation36_spill] sm:$0xff]  ;;  %v5099_v29 = vld [vmem:[#allocation81_spill] sm:$0xff] }
 0x232   : > { %v1509_v1 = vsel %vm4033_vm13, %v3797_v41, 0.0  ;;  %v1510_v34 = vsel %vm4047_vm8, %v3800_v14, 0.0  ;;  %v1266_v51 = vsub.f32 %v5091_v10, %v3820_v15  ;;  %v4085_v54 = vmul.f32 0.6931472, %v2143_v18  ;;  %v5093_v41 = vld [vmem:[#allocation80_spill] sm:$0xff]  ;;  %v2145_v13 = vpop.eup %2144  ;;  %v5107_v18 = vld [vmem:[#allocation59_spill] sm:$0xff] }
 0x233   : > { %v1511_v16 = vsel %vm4059_vm6, %v1479_v26, 0.0  ;;  %v1540_v19 = vadd.f32 %v1509_v1, %v1508_v24  ;;  %951 = vadd.xlane.f32.xlu0 %v950_v6  ;;  %v1552_v55 = vadd.f32 %v1551_v38, %v1519_v0  ;;  %v1267_v30 = vsub.f32 %v5092_v63, %v3820_v15  ;;  %v5104_v26 = vld [vmem:[#allocation121_spill] sm:$0xff]  ;;  %v5105_v38 = vld [vmem:[#allocation122_spill] sm:$0xff] }
 0x234   : > { %vm5094_vm1 = vcmp.gt.f32.partialorder %v5093_v41, 0.0  ;;  %v5097_v2 = vsub.f32 %v5004_v57, %v3820_v15  ;;  %vm5100_vm0 = vcmp.gt.f32.partialorder %v5099_v29, 0.0  ;;  %v5103_v43 = vsub.f32 %v5005_v11, %v3820_v15  ;;  %v5113_v11 = vld [vmem:[#allocation123_spill] sm:$0xff]  ;;  %v5121_v10 = vld [vmem:[#allocation89_spill] sm:$0xff]  ;;  %v5153_v15 = vld [vmem:[#allocation94_spill] sm:$0xff] }
 0x235   : > { %vm4093_vm2 = vmand %vm480_vm7, %vm5094_vm1  ;;  %v1541_v27 = vadd.f32 %v1540_v19, %v1510_v34  ;;  %v1458_v24 = vsub.f32 %v5105_v38, %v1266_v51  ;;  %v5106_v57 = vsub.f32 %v5058_v39, %v3941_v59  ;;  %v5108_v19 = vld [vmem:[#allocation15_spill] sm:$0xff]  ;;  %v4122_v63 = vmul.f32 0.6931472, %v2145_v13  ;;  %1553 = vadd.xlane.f32.xlu1 %v1552_v55  ;;  %v5119_v38 = vld [vmem:[#allocation62_spill] sm:$0xff] }
 0x236   : > { %v1456_v46 = vsub.f32 %v5098_v25, %v5097_v2  ;;  %vm4105_vm11 = vmand %vm480_vm7, %vm5100_vm0  ;;  %v1457_v6 = vsub.f32 %v5104_v26, %v5103_v43  ;;  %v5109_v2 = vld [vmem:[#allocation82_spill] sm:$0xff]  ;;  %v1459_v39 = vsub.f32 %v5113_v11, %v1267_v30  ;;  %vm483_vm8 = vcmp.lt.s32.totalorder %v3601_v20, 136  ;;  %v5114_v51 = vld [vmem:[#allocation83_spill] sm:$0xff] }
 0x237   : > { %v876_v1 = vsub.f32 %v3568_v31, %v5106_v57  ;;  %vm5110_vm13 = vcmp.gt.f32.partialorder %v5109_v2, 0.0  ;;  %v1542_v31 = vadd.f32 %v1541_v27, %v1511_v16  ;;  %vm5115_vm4 = vcmp.gt.f32.partialorder %v5114_v51, 0.0  ;;  %v5118_v26 = vld [vmem:[#allocation61_spill] sm:$0xff]  ;;  %v5120_v27 = vld [vmem:[#allocation63_spill] sm:$0xff]  ;;  %v5157_v25 = vld [vmem:[#allocation96_spill] sm:$0xff] }
 0x238   : > { %vm4128_vm5 = vmand %vm480_vm7, %vm5110_vm13  ;;  %v1488_v55 = vmul.f32 %v1456_v46, %v5093_v41  ;;  %v1489_v13 = vmul.f32 %v1457_v6, %v5099_v29  ;;  %v1490_v43 = vmul.f32 %v1458_v24, %v5109_v2  ;;  %v722_v30 = vsub.f32 %v5118_v26, %v4122_v63  ;;  %v5125_v24 = vld [vmem:[#allocation84_spill] sm:$0xff]  ;;  %v5143_v34 = vld [vmem:[#allocation91_spill] sm:$0xff] }
 0x239   : > { %vm4138_vm6 = vmand %vm480_vm7, %vm5115_vm4  ;;  %v723_v16 = vsub.f32 %v5119_v38, %v4122_v63  ;;  %v724_v57 = vsub.f32 %v5120_v27, %v4122_v63  ;;  %v1491_v11 = vmul.f32 %v1459_v39, %v5114_v51  ;;  %vm5122_vm1 = vcmp.gt.f32.partialorder %v5121_v10, 0.0  ;;  %1543 = vadd.xlane.f32.xlu0 %v1542_v31  ;;  %v5130_v51 = vld [vmem:[#allocation85_spill] sm:$0xff]  ;;  %v5162_v41 = vld [vmem:[#allocation98_spill] sm:$0xff] }
 0x23a   : > { %vm4156_vm0 = vmand %vm481_vm3, %vm5122_vm1  ;;  %v1520_v46 = vsel %vm4093_vm2, %v1488_v55, 0.0  ;;  %v1521_v29 = vsel %vm4105_vm11, %v1489_v13, 0.0  ;;  %v1522_v6 = vsel %vm4128_vm5, %v1490_v43, 0.0  ;;  %vm5126_vm13 = vcmp.gt.f32.partialorder %v5125_v24, 0.0  ;;  %v5135_v13 = vld [vmem:[#allocation127_spill] sm:$0xff] }
 0x23b   : > { %vm4170_vm4 = vmand %vm482_vm14, %vm5126_vm13  ;;  %v5129_v39 = vsub.f32 %v5059_v50, %v3941_v59  ;;  %v1523_v0 = vsel %vm4138_vm6, %v1491_v11, 0.0  ;;  %v1555_v31 = vadd.f32 %v1521_v29, %v1520_v46  ;;  %vm5131_vm2 = vcmp.gt.f32.partialorder %v5130_v51, 0.0  ;;  %v5140_v46 = vld [vmem:[#allocation40_spill] sm:$0xff] }
 0x23c   : > { %vm4184_vm11 = vmand %vm482_vm14, %vm5131_vm2  ;;  %v5134_v55 = vsub.f32 %v5060_v61, %v3941_v59  ;;  %v900_v50 = vmul.f32 %v876_v1, %v5125_v24  ;;  %v1270_v29 = vsub.f32 %v5140_v46, %v3865_v28  ;;  %v5142_v61 = vsub.f32 %v5017_v23, %v3865_v28 }
 0x23d   : > { %v877_v14 = vsub.f32 %v3570_v49, %v5129_v39  ;;  %v5136_v49 = vld [vmem:[#allocation87_spill] sm:$0xff]  ;;  %v5141_v39 = vld [vmem:[#allocation41_spill] sm:$0xff]  ;;  %v1556_v24 = vadd.f32 %v1555_v31, %v1522_v6  ;;  %vm5144_vm1 = vcmp.gt.f32.partialorder %v5143_v34, 0.0 }
 0x23e   : > { %v878_v43 = vsub.f32 %v5135_v13, %v5134_v55  ;;  %vm5137_vm5 = vcmp.gt.f32.partialorder %v5136_v49, 0.0  ;;  %v1271_v59 = vsub.f32 %v5141_v39, %v3865_v28  ;;  %v1460_v1 = vsub.f32 %v3583_v48, %v5142_v61  ;;  %vm4217_vm13 = vmand %vm481_vm3, %vm5144_vm1  ;;  %v5148_v6 = vld [vmem:[#allocation93_spill] sm:$0xff]  ;;  %v5161_v39 = vld [vmem:[#allocation130_spill] sm:$0xff] }
 0x23f   : > { %vm4197_vm6 = vmand %vm482_vm14, %vm5137_vm5  ;;  %v901_v11 = vmul.f32 %v877_v14, %v5130_v51  ;;  %v924_v13 = vsel %vm4170_vm4, %v900_v50, 0.0  ;;  %v5147_v51 = vsub.f32 %v5018_v62, %v3865_v28  ;;  %vm5149_vm2 = vcmp.gt.f32.partialorder %v5148_v6, 0.0 }
 0x240   : > { %v902_v55 = vmul.f32 %v878_v43, %v5136_v49  ;;  %vm4231_vm4 = vmand %vm481_vm3, %vm5149_vm2  ;;  %v1462_v31 = vsub.f32 %v3588_v36, %v1270_v29  ;;  %v5152_v43 = vld [vmem:[#allocation129_spill] sm:$0xff]  ;;  %v1492_v49 = vmul.f32 %v1460_v1, %v5121_v10  ;;  %vm484_vm5 = vcmp.lt.s32.totalorder %v3769_v5, 136  ;;  %v5186_v29 = vld [vmem:[#allocation106_spill] sm:$0xff] }
 0x241   : > { %v1461_v23 = vsub.f32 %v3585_v3, %v5147_v51  ;;  %v925_v48 = vsel %vm4184_vm11, %v901_v11, 0.0  ;;  %v1463_v50 = vsub.f32 %v5152_v43, %v1271_v59  ;;  %v1557_v3 = vadd.f32 %v1556_v24, %v1523_v0  ;;  %v5166_v24 = vld [vmem:[#allocation131_spill] sm:$0xff] }
 0x242   : > { %v926_v28 = vsel %vm4197_vm6, %v902_v55, 0.0  ;;  %v953_v62 = vadd.f32 %v925_v48, %v924_v13  ;;  %vm5154_vm11 = vcmp.gt.f32.partialorder %v5153_v15, 0.0  ;;  %v1494_v46 = vmul.f32 %v1462_v31, %v5148_v6  ;;  %v5173_v6 = vld [vmem:[#allocation48_spill] sm:$0xff]  ;;  %v5174_v31 = vld [vmem:[#allocation102_spill] sm:$0xff] }
 0x243   : > { %vm4245_vm1 = vmand %vm481_vm3, %vm5154_vm11  ;;  %v1493_v36 = vmul.f32 %v1461_v23, %v5143_v34  ;;  %v1495_v10 = vmul.f32 %v1463_v50, %v5153_v15  ;;  %v1524_v0 = vsel %vm4156_vm0, %v1492_v49, 0.0  ;;  %vm5158_vm6 = vcmp.gt.f32.partialorder %v5157_v25, 0.0  ;;  %1558 = vadd.xlane.f32.xlu1 %v1557_v3  ;;  %v5168_v23 = vld [vmem:[#allocation100_spill] sm:$0xff]  ;;  %v5183_v15 = vld [vmem:[#allocation133_spill] sm:$0xff] }
 0x244   : > { %vm4258_vm2 = vmand %vm483_vm8, %vm5158_vm6  ;;  %v879_v34 = vsub.f32 %v5161_v39, %v719_v22  ;;  %v954_v59 = vadd.f32 %v953_v62, %v926_v28  ;;  %vm5163_vm0 = vcmp.gt.f32.partialorder %v5162_v41, 0.0  ;;  %v880_v42 = vsub.f32 %v5166_v24, %v720_v47  ;;  %v5167_v22 = vld [vmem:[#allocation132_spill] sm:$0xff] }
 0x245   : > { %v1525_v61 = vsel %vm4217_vm13, %v1493_v36, 0.0  ;;  %vm4272_vm11 = vmand %vm483_vm8, %vm5163_vm0  ;;  %v881_v55 = vsub.f32 %v5167_v22, %v721_v9  ;;  %v1526_v13 = vsel %vm4231_vm4, %v1494_v46, 0.0  ;;  %v1527_v14 = vsel %vm4245_vm1, %v1495_v10, 0.0  ;;  %v5172_v9 = vld [vmem:[#allocation47_spill] sm:$0xff]  ;;  %v5178_v3 = vld [vmem:[#allocation104_spill] sm:$0xff] }
 0x246   : > { %v1560_v51 = vadd.f32 %v1525_v61, %v1524_v0  ;;  %vm5169_vm13 = vcmp.gt.f32.partialorder %v5168_v23, 0.0  ;;  %v903_v47 = vmul.f32 %v879_v34, %v5157_v25  ;;  %955 = vadd.xlane.f32.xlu0 %v954_v59  ;;  %v904_v7 = vmul.f32 %v880_v42, %v5162_v41  ;;  %v5185_v46 = vld [vmem:[#allocation134_spill] sm:$0xff]  ;;  %v5190_v34 = vld [vmem:[#allocation17_spill] sm:$0xff]  ;;  %v5195_v22 = vld [vmem:[#allocation112_spill] sm:$0xff] }
 0x247   : > { %vm4292_vm6 = vmand %vm483_vm8, %vm5169_vm13  ;;  %v905_v35 = vmul.f32 %v881_v55, %v5168_v23  ;;  %v1274_v48 = vsub.f32 %v5172_v9, %v3912_v8  ;;  %v1275_v2 = vsub.f32 %v5173_v6, %v3912_v8  ;;  %vm5175_vm4 = vcmp.gt.f32.partialorder %v5174_v31, 0.0  ;;  %v5191_v61 = vld [vmem:[#allocation109_spill] sm:$0xff]  ;;  %v5228_v41 = vld [vmem:[#allocation120_spill] sm:$0xff] }
 0x248   : > { %vm4307_vm1 = vmand %vm482_vm14, %vm5175_vm4  ;;  %v1561_v50 = vadd.f32 %v1560_v51, %v1526_v13  ;;  %v927_v49 = vsel %vm4258_vm2, %v903_v47, 0.0  ;;  %vm5179_vm0 = vcmp.gt.f32.partialorder %v5178_v3, 0.0  ;;  %v5182_v62 = vsub.f32 %v5048_v44, %v3912_v8  ;;  %v5199_v13 = vld [vmem:[#allocation18_spill] sm:$0xff]  ;;  %v5200_v51 = vld [vmem:[#allocation19_spill] sm:$0xff] }
 0x249   : > { %vm4317_vm13 = vmand %vm482_vm14, %vm5179_vm0  ;;  %v5184_v36 = vsub.f32 %v5049_v33, %v3912_v8  ;;  %v928_v0 = vsel %vm4272_vm11, %v904_v7, 0.0  ;;  %v929_v25 = vsel %vm4292_vm6, %v905_v35, 0.0  ;;  %vm5187_vm2 = vcmp.gt.f32.partialorder %v5186_v29, 0.0  ;;  %v5201_v35 = vld [vmem:[#allocation113_spill] sm:$0xff] }
 0x24a   : > { %v1464_v11 = vsub.f32 %v5183_v15, %v5182_v62  ;;  %vm4337_vm4 = vmand %vm482_vm14, %vm5187_vm2  ;;  %v1466_v44 = vsub.f32 %v3633_v12, %v1274_v48  ;;  %v1467_v8 = vsub.f32 %v5190_v34, %v1275_v2  ;;  %v1562_v33 = vadd.f32 %v1561_v50, %v1527_v14  ;;  %v5206_v6 = vld [vmem:[#allocation117_spill] sm:$0xff]  ;;  %v5211_v50 = vld [vmem:[#allocation55_spill] sm:$0xff] }
 0x24b   : > { %v1465_v10 = vsub.f32 %v5185_v46, %v5184_v36  ;;  %v957_v59 = vadd.f32 %v928_v0, %v927_v49  ;;  %vm5192_vm0 = vcmp.gt.f32.partialorder %v5191_v61, 0.0  ;;  %vm5196_vm6 = vcmp.gt.f32.partialorder %v5195_v22, 0.0  ;;  %v5212_v62 = vld [vmem:[#allocation114_spill] sm:$0xff]  ;;  %v5217_v46 = vld [vmem:[#allocation137_spill] sm:$0xff]  ;;  %v5244_v2 = vld [vmem:[#allocation140_spill] sm:$0xff] }
 0x24c   : > { %vm4347_vm11 = vmand %vm482_vm14, %vm5192_vm0  ;;  %v1496_v1 = vmul.f32 %v1464_v11, %v5174_v31  ;;  %v1498_v42 = vmul.f32 %v1466_v44, %v5186_v29  ;;  %v1499_v12 = vmul.f32 %v1467_v8, %v5191_v61  ;;  %v882_v14 = vsub.f32 %v5199_v13, %v722_v30  ;;  %1563 = vadd.xlane.f32.xlu1 %v1562_v33  ;;  %v5205_v30 = vld [vmem:[#allocation135_spill] sm:$0xff]  ;;  %v5216_v11 = vld [vmem:[#allocation136_spill] sm:$0xff] }
 0x24d   : > { %v1497_v24 = vmul.f32 %v1465_v10, %v5178_v3  ;;  %vm4359_vm2 = vmand %vm484_vm5, %vm5196_vm6  ;;  %v883_v23 = vsub.f32 %v5200_v51, %v723_v16  ;;  %v958_v32 = vadd.f32 %v957_v59, %v929_v25  ;;  %vm5202_vm0 = vcmp.gt.f32.partialorder %v5201_v35, 0.0  ;;  %v5218_v29 = vld [vmem:[#allocation115_spill] sm:$0xff]  ;;  %v5224_v33 = vld [vmem:[#allocation118_spill] sm:$0xff] }
 0x24e   : > { %v1528_v47 = vsel %vm4307_vm1, %v1496_v1, 0.0  ;;  %vm4379_vm6 = vmand %vm484_vm5, %vm5202_vm0  ;;  %v884_v38 = vsub.f32 %v5205_v30, %v724_v57  ;;  %v1530_v16 = vsel %vm4337_vm4, %v1498_v42, 0.0  ;;  %v1531_v9 = vsel %vm4347_vm11, %v1499_v12, 0.0  ;;  %v5210_v57 = vld [vmem:[#allocation54_spill] sm:$0xff]  ;;  %v5223_v44 = vld [vmem:[#allocation139_spill] sm:$0xff] }
 0x24f   : > { %v1529_v7 = vsel %vm4317_vm13, %v1497_v24, 0.0  ;;  %vm5207_vm1 = vcmp.gt.f32.partialorder %v5206_v6, 0.0  ;;  %v906_v31 = vmul.f32 %v882_v14, %v5195_v22  ;;  %959 = vadd.xlane.f32.xlu0 %v958_v32  ;;  %v907_v63 = vmul.f32 %v883_v23, %v5201_v35  ;;  %v5229_v24 = vld [vmem:[#allocation16_spill] sm:$0xff] }
 0x250   : > { %v1565_v48 = vadd.f32 %v1529_v7, %v1528_v47  ;;  %vm4395_vm13 = vmand %vm484_vm5, %vm5207_vm1  ;;  %v908_v27 = vmul.f32 %v884_v38, %v5206_v6  ;;  %v1278_v43 = vsub.f32 %v5210_v57, %v4006_v4  ;;  %v1279_v49 = vsub.f32 %v5211_v50, %v4006_v4  ;;  %v5230_v12 = vld [vmem:[#allocation60_spill] sm:$0xff]  ;;  %v5240_v38 = vld [vmem:[#allocation21_spill] sm:$0xff] }
 0x251   : > { %v930_v28 = vsel %vm4359_vm2, %v906_v31, 0.0  ;;  %vm5213_vm4 = vcmp.gt.f32.partialorder %v5212_v62, 0.0  ;;  %v1468_v36 = vsub.f32 %v5216_v11, %v1276_v60  ;;  %v1469_v10 = vsub.f32 %v5217_v46, %v1277_v53  ;;  %v5235_v32 = vld [vmem:[#allocation20_spill] sm:$0xff]  ;;  %v5245_v57 = vld [vmem:[#allocation126_spill] sm:$0xff] }
 0x252   : > { %v1566_v3 = vadd.f32 %v1565_v48, %v1530_v16  ;;  %vm4412_vm11 = vmand %vm483_vm8, %vm5213_vm4  ;;  %v931_v0 = vsel %vm4379_vm6, %v907_v63, 0.0  ;;  %v932_v25 = vsel %vm4395_vm13, %v908_v27, 0.0  ;;  %vm5219_vm2 = vcmp.gt.f32.partialorder %v5218_v29, 0.0  ;;  %v5236_v35 = vld [vmem:[#allocation124_spill] sm:$0xff]  ;;  %v5243_v48 = vld [vmem:[#allocation22_spill] sm:$0xff] }
 0x253   : > { %vm4432_vm0 = vmand %vm483_vm8, %vm5219_vm2  ;;  %v1470_v60 = vsub.f32 %v5222_v52, %v1278_v43  ;;  %v1471_v4 = vsub.f32 %v5223_v44, %v1279_v49  ;;  %v961_v53 = vadd.f32 %v931_v0, %v930_v28  ;;  %v1500_v34 = vmul.f32 %v1468_v36, %v5212_v62 }
 0x254   : > { %v1567_v37 = vadd.f32 %v1566_v3, %v1531_v9  ;;  %v1501_v8 = vmul.f32 %v1469_v10, %v5218_v29  ;;  %vm5225_vm6 = vcmp.gt.f32.partialorder %v5224_v33, 0.0  ;;  %v1282_v42 = vsub.f32 %v5229_v24, %v4085_v54  ;;  %vm4474_vm2 = vmand %vm484_vm5, %vm1312_vm10  ;;  %v5241_v9 = vld [vmem:[#allocation125_spill] sm:$0xff]  ;;  %v5247_v3 = vld [vmem:[#allocation128_spill] sm:$0xff] }
 0x255   : > { %vm4444_vm1 = vmand %vm483_vm8, %vm5225_vm6  ;;  %v1502_v61 = vmul.f32 %v1470_v60, %v5224_v33  ;;  %v1503_v1 = vmul.f32 %v1471_v4, %v5228_v41  ;;  %v1283_v22 = vsub.f32 %v5230_v12, %v4085_v54  ;;  %v962_v55 = vadd.f32 %v961_v53, %v932_v25  ;;  %v485_v4 = vld [vmem:[%s4510_s14] sm:$0xff]  ;;  %v487_v53 = vld [vmem:[%s4510_s14 + $0x10] sm:$0xff] }
 0x256   : > { %1568 = vadd.xlane.f32.xlu1 %v1567_v37  ;;  %vm5231_vm13 = vcmp.gt.f32.partialorder %v5228_v41, 0.0  ;;  %v1532_v14 = vsel %vm4412_vm11, %v1500_v34, 0.0  ;;  %v1533_v51 = vsel %vm4432_vm0, %v1501_v8, 0.0  ;;  %v5234_v23 = vsub.f32 %v5107_v18, %v4085_v54  ;;  %v486_v37 = vld [vmem:[%s4510_s14 + $0x8] sm:$0xff] }
 0x257   : > { %vm4458_vm4 = vmand %vm483_vm8, %vm5231_vm13  ;;  %v1570_v7 = vadd.f32 %v1533_v51, %v1532_v14  ;;  %v5239_v30 = vsub.f32 %v5108_v19, %v4085_v54  ;;  %963 = vadd.xlane.f32.xlu0 %v962_v55  ;;  %v1534_v18 = vsel %vm4444_vm1, %v1502_v61, 0.0  ;;  %vm5242_vm11 = vcmp.gt.f32.partialorder %v5241_v9, 0.0  ;;  %v488_v61 = vld [vmem:[%s4510_s14 + $0x18] sm:$0xff] }
 0x258   : > { %v1472_v47 = vsub.f32 %v5235_v32, %v5234_v23  ;;  %vm1377_vm0 = vmand %vm484_vm5, %vm5242_vm11  ;;  %v1474_v6 = vsub.f32 %v5243_v48, %v1282_v42  ;;  %v1475_v31 = vsub.f32 %v5244_v2, %v1283_v22  ;;  %v1535_v19 = vsel %vm4458_vm4, %v1503_v1, 0.0  ;;  %v489_v42 = vld [vmem:[%s4510_s14 + $0x20] sm:$0xff]  ;;  %v491_v32 = vld [vmem:[%s4510_s14 + $0x30] sm:$0xff] }
 0x259   : > { %v1473_v16 = vsub.f32 %v5240_v38, %v5239_v30  ;;  %v1571_v27 = vadd.f32 %v1570_v7, %v1534_v18  ;;  %vm5246_vm10 = vcmp.gt.f32.partialorder %v5245_v57, 0.0  ;;  %vm5248_vm1 = vcmp.gt.f32.partialorder %v5247_v3, 0.0 }
 0x25a   : > { %v1504_v63 = vmul.f32 %v1472_v47, %v5236_v35  ;;  %vm1378_vm6 = vmand %vm484_vm5, %vm5246_vm10  ;;  %v1506_v43 = vmul.f32 %v1474_v6, %v5245_v57  ;;  %v1507_v28 = vmul.f32 %v1475_v31, %v5247_v3  ;;  %v2346_v0 = vmov 0  }
 0x25b   : > { %v1505_v54 = vmul.f32 %v1473_v16, %v5241_v9  ;;  %v1572_v49 = vadd.f32 %v1571_v27, %v1535_v19  ;;  %vm1379_vm13 = vmand %vm484_vm5, %vm5248_vm1  ;;  %1889 = vset.pattern.permute.xlu0 %v2346_v0  ;;  %v493_v33 = vsel %vm477_vm12, %v485_v4, 0.0  ;;  %v494_v59 = vsel %vm478_vm15, %v486_v37, 0.0 }
 0x25c   : > { %v1536_v50 = vsel %vm4474_vm2, %v1504_v63, 0.0  ;;  %v1538_v11 = vsel %vm1378_vm6, %v1506_v43, 0.0  ;;  %v1539_v46 = vsel %vm1379_vm13, %v1507_v28, 0.0  ;;  %v495_v41 = vsel %vm479_vm9, %v487_v53, 0.0  ;;  %v492_v63 = vld [vmem:[%s4510_s14 + $0x38] sm:$0xff] }
 0x25d   : > { %v1537_v62 = vsel %vm1377_vm0, %v1505_v54, 0.0  ;;  %1573 = vadd.xlane.f32.xlu1 %v1572_v49  ;;  %vm973_vm4 = vcmask 7168   ;;  %v496_v12 = vsel %vm480_vm7, %v488_v61, 0.0  ;;  %v497_v45 = vsel %vm481_vm3, %v489_v42, 0.0 }
 0x25e   : > { %v1575_v15 = vadd.f32 %v1537_v62, %v1536_v50  ;;  %v498_v47 = vsel %vm482_vm14, %v490_v40, 0.0  ;;  %v499_v21 = vsel %vm483_vm8, %v491_v32, 0.0  ;;  %v500_v57 = vsel %vm484_vm5, %v492_v63, 0.0 }
 0x260   : > { %v1576_v36 = vadd.f32 %v1575_v15, %v1538_v11 }
 0x262   : > { %v1577_v10 = vadd.f32 %v1576_v36, %v1539_v46 }
 0x264   : > { %1578 = vadd.xlane.f32.xlu1 %v1577_v10 }
 0x29b   : > { %v936_v25 = vpop.xlane.xlu0 %935 }
 0x29c   : > { %v965_v1 = vmul.f32 %v936_v25, %v493_v33 }
 0x29d   : > { %v940_v39 = vpop.xlane.xlu1 %939 }
 0x29e   : > { %v966_v24 = vmul.f32 %v940_v39, %v494_v59  ;;  %v974_v14 = vsel %vm973_vm4, %v965_v1, 0.0 }
 0x2a0   : > { %v975_v58 = vsel %vm973_vm4, %v966_v24, 0.0 }
 0x2a1   : > { %v944_v29 = vpop.xlane.xlu0 %943  ;;  %v976_v26 = vadd.f32 %v975_v58, %v974_v14 }
 0x2a2   : > { %v967_v22 = vmul.f32 %v944_v29, %v495_v41 }
 0x2a4   : > { %v977_v17 = vsel %vm973_vm4, %v967_v22, 0.0 }
 0x2a5   : > { %v978_v48 = vadd.f32 %v977_v17, %v976_v26 }
 0x2b0   : > { %v948_v52 = vpop.xlane.xlu0 %947 }
 0x2b1   : > { %v968_v51 = vmul.f32 %v948_v52, %v496_v12 }
 0x2b3   : > { %v979_v30 = vsel %vm973_vm4, %v968_v51, 0.0 }
 0x2b4   : > { %v980_v27 = vadd.f32 %v979_v30, %v978_v48 }
 0x2bd   : > { %v1549_v60 = vpop.xlane.xlu1 %1548 }
 0x2be   : > { %v1581_v7 = vmul.f32 %v1549_v60, %v494_v59 }
 0x2c0   : > { %v952_v44 = vpop.xlane.xlu0 %951  ;;  %v1589_v56 = vsel %vm973_vm4, %v1581_v7, 0.0 }
 0x2c1   : > { %v969_v35 = vmul.f32 %v952_v44, %v497_v45 }
 0x2c2   : > { %v1554_v34 = vpop.xlane.xlu1 %1553 }
 0x2c3   : > { %v981_v6 = vsel %vm973_vm4, %v969_v35, 0.0  ;;  %v1582_v2 = vmul.f32 %v1554_v34, %v495_v41 }
 0x2c4   : > { %v982_v19 = vadd.f32 %v981_v6, %v980_v27 }
 0x2c5   : > { %v1591_v43 = vsel %vm973_vm4, %v1582_v2, 0.0 }
 0x2c6   : > { %v1544_v8 = vpop.xlane.xlu0 %1543 }
 0x2c7   : > { %v1580_v23 = vmul.f32 %v1544_v8, %v493_v33 }
 0x2c9   : > { %v1588_v38 = vsel %vm973_vm4, %v1580_v23, 0.0 }
 0x2ca   : > { %v1590_v54 = vadd.f32 %v1589_v56, %v1588_v38 }
 0x2cc   : > { %v1592_v28 = vadd.f32 %v1591_v43, %v1590_v54 }
 0x2d0   : > { %v1559_v55 = vpop.xlane.xlu1 %1558 }
 0x2d1   : > { %v1583_v50 = vmul.f32 %v1559_v55, %v496_v12 }
 0x2d3   : > { %v956_v13 = vpop.xlane.xlu0 %955  ;;  %v1593_v10 = vsel %vm973_vm4, %v1583_v50, 0.0 }
 0x2d4   : > { %v970_v16 = vmul.f32 %v956_v13, %v498_v47  ;;  %v1594_v29 = vadd.f32 %v1593_v10, %v1592_v28 }
 0x2d6   : > { %v983_v20 = vsel %vm973_vm4, %v970_v16, 0.0 }
 0x2d7   : > { %v984_v62 = vadd.f32 %v983_v20, %v982_v19 }
 0x2d9   : > { %v1564_v18 = vpop.xlane.xlu1 %1563 }
 0x2da   : > { %v1584_v11 = vmul.f32 %v1564_v18, %v497_v45 }
 0x2dc   : > { %v960_v9 = vpop.xlane.xlu0 %959  ;;  %v1595_v39 = vsel %vm973_vm4, %v1584_v11, 0.0 }
 0x2dd   : > { %v971_v31 = vmul.f32 %v960_v9, %v499_v21  ;;  %v1596_v37 = vadd.f32 %v1595_v39, %v1594_v29 }
 0x2df   : > { %v985_v49 = vsel %vm973_vm4, %v971_v31, 0.0 }
 0x2e0   : > { %v986_v46 = vadd.f32 %v985_v49, %v984_v62 }
 0x2e3   : > { %v1569_v3 = vpop.xlane.xlu1 %1568 }
 0x2e4   : > { %v964_v15 = vpop.xlane.xlu0 %963  ;;  %v1585_v0 = vmul.f32 %v1569_v3, %v498_v47 }
 0x2e5   : > { %v972_v36 = vmul.f32 %v964_v15, %v500_v57 }
 0x2e6   : > { %v1597_v4 = vsel %vm973_vm4, %v1585_v0, 0.0 }
 0x2e7   : > { %v987_v25 = vsel %vm973_vm4, %v972_v36, 0.0  ;;  %v1598_v8 = vadd.f32 %v1597_v4, %v1596_v37 }
 0x2e8   : > { %v988_v5 = vadd.f32 %v987_v25, %v986_v46 }
 0x2ea   : > { %v1574_v52 = vpop.xlane.xlu1 %1573  ;;  %v989_v60 = vrot.slane %v988_v5, 4 }
 0x2eb   : > { %v1586_v44 = vmul.f32 %v1574_v52, %v499_v21 }
 0x2ec   : > { %v990_v53 = vadd.f32 %v989_v60, %v988_v5 }
 0x2ed   : > { %v1599_v34 = vsel %vm973_vm4, %v1586_v44, 0.0 }
 0x2ee   : > { %v991_v61 = vrot.slane %v990_v53, 2  ;;  %v1600_v41 = vadd.f32 %v1599_v34, %v1598_v8 }
 0x2f0   : > { %v992_v42 = vadd.f32 %v991_v61, %v990_v53 }
 0x2f1   : > { %v1579_v33 = vpop.xlane.xlu1 %1578 }
 0x2f2   : > { %v1587_v59 = vmul.f32 %v1579_v33, %v500_v57  ;;  %v993_v13 = vrot.slane %v992_v42, 1 }
 0x2f4   : > { %v1601_v1 = vsel %vm973_vm4, %v1587_v59, 0.0  ;;  %v994_v45 = vadd.f32 %v993_v13, %v992_v42 }
 0x2f5   : > { %v1602_v24 = vadd.f32 %v1601_v1, %v1600_v41 }
 0x2f6   : > { %v995_v51 = vmul.f32 0.0026041667, %v994_v45 }
 0x2f7   : > { %v1603_v12 = vrot.slane %v1602_v24, 4 }
 0x2f9   : > { %v1604_v22 = vadd.f32 %v1603_v12, %v1602_v24 }
 0x2fb   : > { %v1605_v55 = vrot.slane %v1604_v22, 2 }
 0x2fd   : > { %v1606_v40 = vadd.f32 %v1605_v55, %v1604_v22 }
 0x2ff   : > { %v1607_v14 = vrot.slane %v1606_v40, 1 }
 0x301   : > { %v1608_v58 = vadd.f32 %v1607_v14, %v1606_v40 }
 0x303   : > { %v1609_v23 = vmul.f32 0.001953125, %v1608_v58 }
 0x305   : > { %v1610_v32 = vadd.f32 %v1609_v23, %v995_v51 }
 0x307   : > { %v1611_v47 = vmul.f32 0.0009765625, %v1610_v32 }
 0x309   : > { %1614 = vperm.xlu0 %1889, %v1611_v47  }
 0x388   : > { %v1615_v17 = vpop.permute.xlu0 %1614 }
 0x389   : > { %1617 = vst [vmem:[%s419_s11] sm:$0xff] %v1615_v17 }
 0x38a   : > { %2271 = shalt.err (!%p2268_p2)
}
 0x38b   : > { %s2272_s12 = scalar_lea.hbm %s4559_s25, 128  ;;  %s2276_s10 = scalar_lea.hbm %s4605_s5, 384 }
 0x38c   : > { %p2273_p12 = scmp.ne.s32.totalorder %s4559_s25, %s2272_s12  ;;  %p2277_p8 = scmp.lt.u32.totalorder %s4559_s25, %s4605_s5 }
 0x38d   : > { %p2278_p1 = scmp.lt.u32.totalorder %s2276_s10, %s2272_s12  ;;  %p2280_p5 = scmp.lt.u32.totalorder %s2272_s12, %s4559_s25 }
 0x38e   : > { %p2274_p0 = pnand %p2273_p12, %p5249_p3 }
 0x38f   : > { %p2279_p6 = por %p2278_p1, %p2277_p8 }
 0x390   : > { %p2275_p11 = pneg %p2274_p0 }
 0x391   : > { %p2281_p7 = por %p2280_p5, %p2279_p6 }
 0x393   : > { %p2282_p9 = pnand %p2281_p7, %p2275_p11 }
 0x395   : > { %2285 = shalt.err (!%p2282_p9)
}
 0x396   : > { %1841 = dma.vmem_to_hbm [thread:$0]  (%p5249_p3), %s4554_s15, 128, %s4559_s25, %s1619_s23  }
 0x397 PF: > { %p1847_p13 = scmp.ge.s32.totalorder %s2332_s21, 2  ;;  %s1644_s11 = sand.u32 1, %s2320_s18  }
 0x398   : > { %p5250_p4 = scmp.ne.s32.totalorder %s4817_s6, 0  ;;  %s1645_s16 = scalar_lea.sflag [#allocation4], %s1644_s11 }
 0x39a   : > { %p1844_p10 = pnand %p1847_p13, %p5250_p4 }
 0x39c   : > { %2315 = dma.done.wait (!%p1844_p10), %s1645_s16, 128  }
 0x39d   : > { %2317 = vsyncadd (!%p1844_p10), %s1645_s16, 4294967168  ;;  %p24_p2 = scmp.ge.s32.totalorder %s2403_s24, 5   ;;  %s5251_s18 = smov %s2324_s19 }
 0x39e   : > { %s5252_s19 = smov %s2328_s20  ;;  %s5253_s20 = smov %s2415_s27 }
 0x39f   : > { %s5254_s21 = smov %s2403_s24  ;;  %26 = sbr.rel (!%p24_p2) target bundleno = 9 (0x9), region = 125 }
 0x3a6   :  { %1650 = vsyncpa [#allocation3], 1 }
 0x3a7   :  { %1652 = vsyncpa [#allocation3 + $0x1], 1 }
 0x3a8   :  { %1653 = vsyncpa [#allocation6], 1 }
 0x3a9   :  { %1655 = vsyncpa [#allocation6 + $0x1], 1 }
 0x3aa   :  { %1656 = vsyncpa [#allocation9], 1 }
 0x3ab   :  { %1658 = vsyncpa [#allocation9 + $0x1], 1 }
 0x3ac   :  { %1659 = vsyncpa [#allocation4], 1 }
 0x3ad   :  { %1661 = vsyncpa [#allocation4 + $0x1], 1 }

</bundles_post_ra>
